<compile_context>
chip_gen: v7x
topology: tpu7x:2x2x1
jax: 0.10.0
libtpu: 0.0.40
codegen_flags: <defaults>
</compile_context>

<pallas_src>
import jax
import jax.numpy as jnp
from jax.experimental import pallas as pl
from jax.experimental.pallas import tpu as pltpu

H1, H2 = 800, 600            # logical hidden sizes (PyTorch Actor)
H1_PAD, H2_PAD = 896, 640    # 128-lane aligned (zero-padded, mathematically identical)
ALIGN = 16                   # batch-tile row alignment (bf16-friendly sublane tile)


def _round_up(x, m):
    return (x + m - 1) // m * m


def _cdiv(a, b):
    return -(-a // b)


def _choose_batch_tiling(batch, target_tile=1024, min_split_tile=512):
    """Pick (batch_tile, padded_batch, n_tiles).

    - padded_batch only rounds up to ALIGN (no whole-tile waste on ragged batches)
    - n_tiles is kept even / >= 2 when each tile can stay >= min_split_tile rows,
      so the "parallel" grid axis actually uses both v7x TensorCores.
    """
    pb = _round_up(batch, ALIGN)
    n = _cdiv(pb, target_tile)
    if n == 1 and pb >= 2 * min_split_tile:
        n = 2
    elif n > 1 and n % 2 == 1 and pb // (n + 1) >= min_split_tile:
        n += 1
    bt = _round_up(_cdiv(pb, n), ALIGN)
    padded = bt * n
    return bt, padded, n


def actor_kernel(s_ref, w1_ref, b1_ref, w2_ref, b2_ref, w3_ref, b3_ref, out_ref):
    # Layer 1: Linear(state_pad -> 896[800]) + ReLU   (bf16 MXU, f32 accum)
    h1 = jnp.dot(s_ref[...], w1_ref[...], preferred_element_type=jnp.float32)
    h1 = jnp.maximum(h1 + b1_ref[...], 0.0)
    # Layer 2: Linear(896[800] -> 640[600]) + ReLU
    h2 = jnp.dot(h1.astype(jnp.bfloat16), w2_ref[...],
                 preferred_element_type=jnp.float32)
    h2 = jnp.maximum(h2 + b2_ref[...], 0.0)
    # Layer 3: Linear(640[600] -> act_pad) + tanh, bf16 lane-dense store
    h3 = jnp.dot(h2.astype(jnp.bfloat16), w3_ref[...],
                 preferred_element_type=jnp.float32)
    out_ref[...] = jnp.tanh(h3 + b3_ref[...]).astype(out_ref.dtype)


def actor_forward(s, params, action_dim, *, target_batch_tile=1024):
    """s: (batch, state_dim) f32. params: padded bf16 weights + f32 biases."""
    w1, b1, w2, b2, w3, b3 = params
    batch, state_dim = s.shape
    sd_pad = w1.shape[0]
    a_pad = w3.shape[1]

    bt, padded_batch, n_tiles = _choose_batch_tiling(batch, target_batch_tile)

    # Pad batch rows + state lanes, ship activations as bf16 (kernel cast it
    # to bf16 anyway, so numerics are unchanged and input DMA is halved).
    s_p = jnp.pad(s.astype(jnp.bfloat16),
                  ((0, padded_batch - batch), (0, sd_pad - state_dim)))

    flops = 2 * padded_batch * (sd_pad * H1_PAD + H1_PAD * H2_PAD + H2_PAD * a_pad)
    bytes_accessed = (
        padded_batch * sd_pad * 2              # bf16 input activations
        + padded_batch * a_pad * 2             # bf16 output
        + sum(int(p.size) * p.dtype.itemsize for p in params)  # weights/biases
    )
    cost = pl.CostEstimate(flops=flops,
                           transcendentals=padded_batch * a_pad,
                           bytes_accessed=bytes_accessed)

    out = pl.pallas_call(
        actor_kernel,
        out_shape=jax.ShapeDtypeStruct((padded_batch, a_pad), jnp.bfloat16),
        grid=(n_tiles,),
        in_specs=[
            # Activations: tiled over the batch grid axis.
            pl.BlockSpec((bt, sd_pad), lambda i: (i, 0)),
            # Weights / biases: constant index_map -> stay resident in VMEM.
            pl.BlockSpec(w1.shape, lambda i: (0, 0)),
            pl.BlockSpec(b1.shape, lambda i: (0, 0)),
            pl.BlockSpec(w2.shape, lambda i: (0, 0)),
            pl.BlockSpec(b2.shape, lambda i: (0, 0)),
            pl.BlockSpec(w3.shape, lambda i: (0, 0)),
            pl.BlockSpec(b3.shape, lambda i: (0, 0)),
        ],
        out_specs=pl.BlockSpec((bt, a_pad), lambda i: (i, 0)),
        compiler_params=pltpu.CompilerParams(
            dimension_semantics=("parallel",),   # batch tiles over TCs (v7x)
            vmem_limit_bytes=32 * 1024 * 1024,   # ~14 MB needed at bt=1024
        ),
        cost_estimate=cost,
    )(s_p, w1, b1, w2, b2, w3, b3)

    # Strip batch padding / padded action lanes, return f32 to the caller.
    return out[:batch, :action_dim].astype(jnp.float32)


def init_actor_params(key, state_dim, action_dim):
    """PyTorch-Linear-style init: U(-1/sqrt(fan_in), 1/sqrt(fan_in)).

    Returns (padded bf16 kernel params, unpadded f32 reference params).
    Weights are stored as (in_features, out_features); padding is zeros so the
    extra rows/columns contribute nothing."""
    sd_pad = _round_up(state_dim, 128)
    act_pad = _round_up(action_dim, 128)
    ks = jax.random.split(key, 6)
    logical = [(state_dim, H1), (H1, H2), (H2, action_dim)]
    padded = [(sd_pad, H1_PAD), (H1_PAD, H2_PAD), (H2_PAD, act_pad)]

    kernel_params, ref_params = [], []
    for i, ((fi, fo), (pi, po)) in enumerate(zip(logical, padded)):
        bound = 1.0 / (fi ** 0.5)
        w = jax.random.uniform(ks[2 * i], (fi, fo), jnp.float32, -bound, bound)
        b = jax.random.uniform(ks[2 * i + 1], (1, fo), jnp.float32, -bound, bound)
        ref_params.extend([w, b])

        w_pad = jnp.zeros((pi, po), jnp.bfloat16).at[:fi, :fo].set(
            w.astype(jnp.bfloat16))
        b_pad = jnp.zeros((1, po), jnp.float32).at[:, :fo].set(b)
        kernel_params.extend([w_pad, b_pad])
    return tuple(kernel_params), tuple(ref_params)


def actor_reference(s, ref_params):
    """Pure-JAX reference mirroring the kernel's numerics (bf16 matmul inputs,
    f32 accumulation / bias / activations)."""
    w1, b1, w2, b2, w3, b3 = ref_params
    bf = lambda x: x.astype(jnp.bfloat16)
    h1 = jnp.maximum(
        jnp.dot(bf(s), bf(w1), preferred_element_type=jnp.float32) + b1, 0.0)
    h2 = jnp.maximum(
        jnp.dot(bf(h1), bf(w2), preferred_element_type=jnp.float32) + b2, 0.0)
    return jnp.tanh(
        jnp.dot(bf(h2), bf(w3), preferred_element_type=jnp.float32) + b3)


if __name__ == "__main__":
    key = jax.random.PRNGKey(0)
    k_param, k_input = jax.random.split(key)

    batch, state_dim, action_dim = 2, 24, 2
    kernel_params, ref_params = init_actor_params(k_param, state_dim, action_dim)
    s = jax.random.normal(k_input, (batch, state_dim), jnp.float32)

    out = actor_forward(s, kernel_params, action_dim)
    out = jax.block_until_ready(out)

    ref = actor_reference(s, ref_params)
    assert out.shape == (batch, action_dim)
    assert jnp.allclose(out, ref, atol=2e-2, rtol=2e-2), float(
        jnp.max(jnp.abs(out - ref)))

    print("KERNEL_OK")
</pallas_src>

<mosaic_0001>
module attributes {stable_mosaic.version = 11 : i64} {
  func.func @actor_kernel(%arg0: i32, %arg1: memref<16x128xbf16, #tpu.memory_space<vmem>>, %arg2: memref<128x896xbf16, #tpu.memory_space<vmem>>, %arg3: memref<1x896xf32, #tpu.memory_space<vmem>>, %arg4: memref<896x640xbf16, #tpu.memory_space<vmem>>, %arg5: memref<1x640xf32, #tpu.memory_space<vmem>>, %arg6: memref<640x128xbf16, #tpu.memory_space<vmem>>, %arg7: memref<1x128xf32, #tpu.memory_space<vmem>>, %arg8: memref<16x128xbf16, #tpu.memory_space<vmem>>) attributes {dimension_semantics = [#tpu.dimension_semantics<parallel>], iteration_bounds = array<i64: 1>, scalar_prefetch = 0 : i64, scratch_operands = 0 : i64, tpu.core_type = #tpu.core_type<tc>, window_params = [{transform_indices = @transform_0, window_bounds = array<i64: 16, 128>}, {pipeline_mode = #tpu.pipeline_mode<synchronous>, transform_indices = @transform_1, window_bounds = array<i64: 128, 896>}, {pipeline_mode = #tpu.pipeline_mode<synchronous>, transform_indices = @transform_2, window_bounds = array<i64: 1, 896>}, {pipeline_mode = #tpu.pipeline_mode<synchronous>, transform_indices = @transform_3, window_bounds = array<i64: 896, 640>}, {pipeline_mode = #tpu.pipeline_mode<synchronous>, transform_indices = @transform_4, window_bounds = array<i64: 1, 640>}, {pipeline_mode = #tpu.pipeline_mode<synchronous>, transform_indices = @transform_5, window_bounds = array<i64: 640, 128>}, {pipeline_mode = #tpu.pipeline_mode<synchronous>, transform_indices = @transform_6, window_bounds = array<i64: 1, 128>}, {transform_indices = @transform_7, window_bounds = array<i64: 16, 128>}]} {
    %c0 = arith.constant 0 : index
    %c0_0 = arith.constant 0 : index
    %0 = vector.load %arg1[%c0, %c0_0] : memref<16x128xbf16, #tpu.memory_space<vmem>>, vector<16x128xbf16>
    %c0_1 = arith.constant 0 : index
    %c0_2 = arith.constant 0 : index
    %1 = vector.load %arg2[%c0_1, %c0_2] : memref<128x896xbf16, #tpu.memory_space<vmem>>, vector<128x896xbf16>
    %cst = arith.constant dense<0.000000e+00> : vector<16x896xf32>
    %2 = tpu.matmul %0, %1, %cst {dimension_numbers = #tpu.dot_dimension_numbers<[1], [0], [0], [1], [0, 0, 1, 1], [], []>} : vector<16x128xbf16>, vector<128x896xbf16>, vector<16x896xf32> -> vector<16x896xf32>
    %c0_3 = arith.constant 0 : index
    %c0_4 = arith.constant 0 : index
    %3 = vector.load %arg3[%c0_3, %c0_4] : memref<1x896xf32, #tpu.memory_space<vmem>>, vector<1x896xf32>
    %4 = vector.broadcast %3 : vector<1x896xf32> to vector<16x896xf32>
    %5 = arith.addf %2, %4 : vector<16x896xf32>
    %cst_5 = arith.constant 0.000000e+00 : f32
    %6 = vector.broadcast %cst_5 : f32 to vector<16x896xf32>
    %7 = arith.maximumf %5, %6 : vector<16x896xf32>
    %8 = arith.truncf %7 : vector<16x896xf32> to vector<16x896xbf16>
    %c0_6 = arith.constant 0 : index
    %c0_7 = arith.constant 0 : index
    %9 = vector.load %arg4[%c0_6, %c0_7] : memref<896x640xbf16, #tpu.memory_space<vmem>>, vector<896x640xbf16>
    %cst_8 = arith.constant dense<0.000000e+00> : vector<16x640xf32>
    %10 = tpu.matmul %8, %9, %cst_8 {dimension_numbers = #tpu.dot_dimension_numbers<[1], [0], [0], [1], [0, 0, 1, 1], [], []>} : vector<16x896xbf16>, vector<896x640xbf16>, vector<16x640xf32> -> vector<16x640xf32>
    %c0_9 = arith.constant 0 : index
    %c0_10 = arith.constant 0 : index
    %11 = vector.load %arg5[%c0_9, %c0_10] : memref<1x640xf32, #tpu.memory_space<vmem>>, vector<1x640xf32>
    %12 = vector.broadcast %11 : vector<1x640xf32> to vector<16x640xf32>
    %13 = arith.addf %10, %12 : vector<16x640xf32>
    %cst_11 = arith.constant 0.000000e+00 : f32
    %14 = vector.broadcast %cst_11 : f32 to vector<16x640xf32>
    %15 = arith.maximumf %13, %14 : vector<16x640xf32>
    %16 = arith.truncf %15 : vector<16x640xf32> to vector<16x640xbf16>
    %c0_12 = arith.constant 0 : index
    %c0_13 = arith.constant 0 : index
    %17 = vector.load %arg6[%c0_12, %c0_13] : memref<640x128xbf16, #tpu.memory_space<vmem>>, vector<640x128xbf16>
    %cst_14 = arith.constant dense<0.000000e+00> : vector<16x128xf32>
    %18 = tpu.matmul %16, %17, %cst_14 {dimension_numbers = #tpu.dot_dimension_numbers<[1], [0], [0], [1], [0, 0, 1, 1], [], []>} : vector<16x640xbf16>, vector<640x128xbf16>, vector<16x128xf32> -> vector<16x128xf32>
    %c0_15 = arith.constant 0 : index
    %c0_16 = arith.constant 0 : index
    %19 = vector.load %arg7[%c0_15, %c0_16] : memref<1x128xf32, #tpu.memory_space<vmem>>, vector<1x128xf32>
    %20 = vector.broadcast %19 : vector<1x128xf32> to vector<16x128xf32>
    %21 = arith.addf %18, %20 : vector<16x128xf32>
    %22 = math.tanh %21 : vector<16x128xf32>
    %23 = arith.truncf %22 : vector<16x128xf32> to vector<16x128xbf16>
    %c0_17 = arith.constant 0 : index
    %c0_18 = arith.constant 0 : index
    %24 = vector.load %arg8[%c0_17, %c0_18] : memref<16x128xbf16, #tpu.memory_space<vmem>>, vector<16x128xbf16>
    tpu.vector_store %arg8[%c0_17, %c0_18], %23 {strides = array<i32>} : memref<16x128xbf16, #tpu.memory_space<vmem>>, vector<16x128xbf16>,
    return
  }
  func.func @transform_0(%arg0: i32) -> (i32, i32) {
    %c0_i32 = arith.constant 0 : i32
    %c0_i32_0 = arith.constant 0 : i32
    return %arg0, %c0_i32 : i32, i32
  }
  func.func @transform_1(%arg0: i32) -> (i32, i32) {
    %c0_i32 = arith.constant 0 : i32
    %c0_i32_0 = arith.constant 0 : i32
    %c0_i32_1 = arith.constant 0 : i32
    return %c0_i32, %c0_i32_0 : i32, i32
  }
  func.func @transform_2(%arg0: i32) -> (i32, i32) {
    %c0_i32 = arith.constant 0 : i32
    %c0_i32_0 = arith.constant 0 : i32
    %c0_i32_1 = arith.constant 0 : i32
    return %c0_i32, %c0_i32_0 : i32, i32
  }
  func.func @transform_3(%arg0: i32) -> (i32, i32) {
    %c0_i32 = arith.constant 0 : i32
    %c0_i32_0 = arith.constant 0 : i32
    %c0_i32_1 = arith.constant 0 : i32
    return %c0_i32, %c0_i32_0 : i32, i32
  }
  func.func @transform_4(%arg0: i32) -> (i32, i32) {
    %c0_i32 = arith.constant 0 : i32
    %c0_i32_0 = arith.constant 0 : i32
    %c0_i32_1 = arith.constant 0 : i32
    return %c0_i32, %c0_i32_0 : i32, i32
  }
  func.func @transform_5(%arg0: i32) -> (i32, i32) {
    %c0_i32 = arith.constant 0 : i32
    %c0_i32_0 = arith.constant 0 : i32
    %c0_i32_1 = arith.constant 0 : i32
    return %c0_i32, %c0_i32_0 : i32, i32
  }
  func.func @transform_6(%arg0: i32) -> (i32, i32) {
    %c0_i32 = arith.constant 0 : i32
    %c0_i32_0 = arith.constant 0 : i32
    %c0_i32_1 = arith.constant 0 : i32
    return %c0_i32, %c0_i32_0 : i32, i32
  }
  func.func @transform_7(%arg0: i32) -> (i32, i32) {
    %c0_i32 = arith.constant 0 : i32
    %c0_i32_0 = arith.constant 0 : i32
    return %arg0, %c0_i32 : i32, i32
  }
}

</mosaic_0001>

<bundles_post_ra>
// kernel: tpu_custom_call.1
= control target key start
LH: loop header
LB: loop body
LE: loop exit
PB: predicated region body
PF: predicated region fallthrough
CT: control target
= control target key end

     0   :  { %12 = vsyncpa [#allocation3], 0  ;;  %s5148_s0 = inlined_call_operand.hbm [shape: bf16[16,128], index: 0, kind: input, shape index: {}]   ;;  %s5149_s1 = inlined_call_operand.hbm [shape: bf16[128,896], index: 1, kind: input, shape index: {}]   ;;  %s5150_s2 = inlined_call_operand.hbm [shape: f32[1,896], index: 2, kind: input, shape index: {}]   ;;  %s5151_s3 = inlined_call_operand.hbm [shape: bf16[896,640], index: 3, kind: input, shape index: {}]   ;;  %s5152_s4 = inlined_call_operand.hbm [shape: f32[1,640], index: 4, kind: input, shape index: {}]   ;;  %s5153_s5 = inlined_call_operand.hbm [shape: bf16[640,128], index: 5, kind: input, shape index: {}]   ;;  %s5154_s6 = inlined_call_operand.hbm [shape: f32[1,128], index: 6, kind: input, shape index: {}]   ;;  %s5155_s7 = inlined_call_operand.hbm [shape: bf16[16,128], index: 7, kind: output, shape index: {}]  }
   0x1   :  { %13 = vsyncpa [#allocation6], 0 }
   0x2   :  { %14 = vsyncpa [#allocation9], 0 }
   0x3   :  { %15 = vsyncpa [#allocation12], 0 }
   0x4   :  { %16 = vsyncpa [#allocation4], 0  ;;  %s4865_s24 = smov [#allocation5]   ;;  %s4679_s28 = scalar_lea.hbm %s5149_s1, 7168 }
   0x5   :  { %s34_s25 = sshll.u32 %s4865_s24, 4  ;;  %p4680_p0 = scmp.ne.s32.totalorder %s5149_s1, %s4679_s28  ;;  %s35_s25 = int_to_ptr.vmem [resolvable:$true] %s34_s25 }
   0x6   :  { %p4683_p1 = scmp.lt.u32.totalorder %s4679_s28, %s5149_s1 }
   0x8   :  { %p4685_p2 = pnand %p4683_p1, %p4680_p0 }
   0xa   :  { %4688 = shalt.err (!%p4685_p2)
}
   0xb   :  { %s4689_s10 = scalar_lea.vmem %s35_s25, 7168  ;;  %p4694_p4 = scmp.lt.s32.totalorder %s35_s25, %s35_s25 }
   0xc   :  { %p4690_p3 = scmp.ne.s32.totalorder %s35_s25, %s4689_s10  ;;  %p4695_p5 = scmp.lt.s32.totalorder %s4689_s10, %s4689_s10 }
   0xe   :  { %p4696_p6 = por %p4695_p5, %p4694_p4 }
  0x10   :  { %p4697_p7 = pnand %p4696_p6, %p4690_p3 }
  0x12   :  { %4700 = shalt.err (!%p4697_p7)
}
  0x13   :  { %s4866_s11 = smov 448   ;;  %s4867_s12 = smov 28  }
  0x14   :  { %40 = dma.hbm_to_vmem [thread:$0]  %s5149_s1, 7168, %s35_s25, [#allocation6], %s4866_s11, %s4866_s11, %s4867_s12  }
  0x15   :  { %s4868_s15 = smov [#allocation8]   ;;  %s4701_s19 = scalar_lea.hbm %s5151_s3, 35840 }
  0x16   :  { %s56_s16 = sshll.u32 %s4868_s15, 4  ;;  %p4702_p8 = scmp.ne.s32.totalorder %s5151_s3, %s4701_s19  ;;  %s57_s16 = int_to_ptr.vmem [resolvable:$true] %s56_s16 }
  0x17   :  { %p4705_p9 = scmp.lt.u32.totalorder %s4701_s19, %s5151_s3 }
  0x19   :  { %p4707_p10 = pnand %p4705_p9, %p4702_p8 }
  0x1b   :  { %4710 = shalt.err (!%p4707_p10)
}
  0x1c   :  { %s4711_s24 = scalar_lea.vmem %s57_s16, 35840  ;;  %p4716_p12 = scmp.lt.s32.totalorder %s57_s16, %s57_s16 }
  0x1d   :  { %p4712_p11 = scmp.ne.s32.totalorder %s57_s16, %s4711_s24  ;;  %p4717_p13 = scmp.lt.s32.totalorder %s4711_s24, %s4711_s24 }
  0x1f   :  { %p4718_p0 = por %p4717_p13, %p4716_p12 }
  0x21   :  { %p4719_p1 = pnand %p4718_p0, %p4712_p11 }
  0x23   :  { %4722 = shalt.err (!%p4719_p1)
}
  0x24   :  { %s4869_s1 = smov 320   ;;  %s4870_s25 = smov 20  }
  0x25   :  { %62 = dma.hbm_to_vmem [thread:$0]  %s5151_s3, 35840, %s57_s16, [#allocation9], %s4869_s1, %s4869_s1, %s4870_s25  }
  0x26   :  { %s4871_s28 = smov [#allocation11]   ;;  %s4872_s30 = smov [#allocation2]  }
  0x27   :  { %s78_s29 = sshll.u32 %s4871_s28, 4  ;;  %s22_s8 = sshll.u32 %s4872_s30, 4  ;;  %s79_s29 = int_to_ptr.vmem [resolvable:$true] %s78_s29  ;;  %s4946_s8 = int_to_ptr.vmem [resolvable:$true] %s22_s8 }
  0x28   :  { %s4723_s11 = scalar_lea.hbm %s5153_s5, 5120 }
  0x29   :  { %p4724_p2 = scmp.ne.s32.totalorder %s5153_s5, %s4723_s11  ;;  %p4727_p3 = scmp.lt.u32.totalorder %s4723_s11, %s5153_s5 }
  0x2b   :  { %p4729_p4 = pnand %p4727_p3, %p4724_p2 }
  0x2d   :  { %4732 = shalt.err (!%p4729_p4)
}
  0x2e   :  { %s4733_s3 = scalar_lea.vmem %s79_s29, 5120  ;;  %p4738_p6 = scmp.lt.s32.totalorder %s79_s29, %s79_s29 }
  0x2f   :  { %p4734_p5 = scmp.ne.s32.totalorder %s79_s29, %s4733_s3  ;;  %p4739_p7 = scmp.lt.s32.totalorder %s4733_s3, %s4733_s3 }
  0x31   :  { %p4740_p8 = por %p4739_p7, %p4738_p6 }
  0x33   :  { %p4741_p9 = pnand %p4740_p8, %p4734_p5 }
  0x35   :  { %4744 = shalt.err (!%p4741_p9)
}
  0x36   :  { %s4873_s16 = smov 64   ;;  %s4874_s17 = smov 4  }
  0x37   :  { %84 = dma.hbm_to_vmem [thread:$0]  %s5153_s5, 5120, %s79_s29, [#allocation12], %s4873_s16, %s4873_s16, %s4874_s17  }
  0x38   :  { %s4745_s22 = scalar_lea.hbm %s5148_s0, 128 }
  0x39   :  { %p4746_p10 = scmp.ne.s32.totalorder %s5148_s0, %s4745_s22  ;;  %p4749_p11 = scmp.lt.u32.totalorder %s4745_s22, %s5148_s0 }
  0x3b   :  { %p4751_p12 = pnand %p4749_p11, %p4746_p10 }
  0x3d   :  { %4754 = shalt.err (!%p4751_p12)
}
  0x3e   :  { %s4755_s26 = scalar_lea.vmem %s4946_s8, 128  ;;  %p4760_p0 = scmp.lt.s32.totalorder %s4946_s8, %s4946_s8 }
  0x3f   :  { %p4756_p13 = scmp.ne.s32.totalorder %s4946_s8, %s4755_s26  ;;  %p4761_p1 = scmp.lt.s32.totalorder %s4755_s26, %s4755_s26 }
  0x41   :  { %p4762_p2 = por %p4761_p1, %p4760_p0 }
  0x43   :  { %p4763_p3 = pnand %p4762_p2, %p4756_p13 }
  0x45   :  { %4766 = shalt.err (!%p4763_p3)
}
  0x46   :  { %28 = dma.hbm_to_vmem [thread:$0]  %s5148_s0, 128, %s4946_s8, [#allocation3], %s4873_s16, %s4873_s16, %s4874_s17  }
  0x47   :  { %s4875_s28 = smov [#allocation7]   ;;  %s4876_s30 = smov [#allocation10]  }
  0x48   :  { %s47_s29 = sshll.u32 %s4875_s28, 4  ;;  %s69_s9 = sshll.u32 %s4876_s30, 4  ;;  %s48_s29 = int_to_ptr.vmem [resolvable:$true] %s47_s29  ;;  %s70_s9 = int_to_ptr.vmem [resolvable:$true] %s69_s9 }
  0x49   :  { %s4767_s12 = scalar_lea.hbm %s5150_s2, 112 }
  0x4a   :  { %p4768_p4 = scmp.ne.s32.totalorder %s5150_s2, %s4767_s12  ;;  %p4771_p5 = scmp.lt.u32.totalorder %s4767_s12, %s5150_s2 }
  0x4c   :  { %p4773_p6 = pnand %p4771_p5, %p4768_p4 }
  0x4e   :  { %4776 = shalt.err (!%p4773_p6)
}
  0x4f   :  { %s4777_s0 = scalar_lea.vmem %s48_s29, 112  ;;  %s4781_s8 = scalar_lea.vmem %s48_s29, 128 }
  0x50   :  { %p4778_p7 = scmp.ne.s32.totalorder %s48_s29, %s4777_s0  ;;  %p4782_p8 = scmp.lt.s32.totalorder %s48_s29, %s48_s29 }
  0x51   :  { %p4783_p9 = scmp.lt.s32.totalorder %s4781_s8, %s4777_s0 }
  0x53   :  { %p4784_p10 = por %p4783_p9, %p4782_p8 }
  0x55   :  { %p4785_p11 = pnand %p4784_p10, %p4778_p7 }
  0x57   :  { %4788 = shalt.err (!%p4785_p11)
}
  0x58   :  { %50 = dma.hbm_to_vmem [thread:$0]  %s5150_s2, 112, %s48_s29, [#allocation6]  }
  0x59   :  { %s4789_s22 = scalar_lea.hbm %s5152_s4, 80 }
  0x5a   :  { %p4790_p12 = scmp.ne.s32.totalorder %s5152_s4, %s4789_s22  ;;  %p4793_p13 = scmp.lt.u32.totalorder %s4789_s22, %s5152_s4 }
  0x5c   :  { %p4795_p0 = pnand %p4793_p13, %p4790_p12 }
  0x5e   :  { %4798 = shalt.err (!%p4795_p0)
}
  0x5f   :  { %s4799_s26 = scalar_lea.vmem %s70_s9, 80  ;;  %s4803_s5 = scalar_lea.vmem %s70_s9, 96 }
  0x60   :  { %p4800_p1 = scmp.ne.s32.totalorder %s70_s9, %s4799_s26  ;;  %p4804_p2 = scmp.lt.s32.totalorder %s70_s9, %s70_s9 }
  0x61   :  { %p4805_p3 = scmp.lt.s32.totalorder %s4803_s5, %s4799_s26 }
  0x63   :  { %p4806_p4 = por %p4805_p3, %p4804_p2 }
  0x65   :  { %p4807_p5 = pnand %p4806_p4, %p4800_p1 }
  0x67   :  { %4810 = shalt.err (!%p4807_p5)
}
  0x68   :  { %72 = dma.hbm_to_vmem [thread:$0]  %s5152_s4, 80, %s70_s9, [#allocation9]  }
  0x69   :  { %s4877_s28 = smov [#allocation13]   ;;  %s4811_s11 = scalar_lea.hbm %s5154_s6, 16 }
  0x6a   :  { %s91_s29 = sshll.u32 %s4877_s28, 4  ;;  %p4812_p6 = scmp.ne.s32.totalorder %s5154_s6, %s4811_s11  ;;  %s92_s29 = int_to_ptr.vmem [resolvable:$true] %s91_s29 }
  0x6b   :  { %p4815_p7 = scmp.lt.u32.totalorder %s4811_s11, %s5154_s6 }
  0x6d   :  { %p4817_p8 = pnand %p4815_p7, %p4812_p6 }
  0x6f   :  { %4820 = shalt.err (!%p4817_p8)
}
  0x70   :  { %s4821_s3 = scalar_lea.vmem %s92_s29, 16  ;;  %s4825_s4 = scalar_lea.vmem %s92_s29, 32 }
  0x71   :  { %p4822_p9 = scmp.ne.s32.totalorder %s92_s29, %s4821_s3  ;;  %p4826_p10 = scmp.lt.s32.totalorder %s92_s29, %s92_s29 }
  0x72   :  { %p4827_p11 = scmp.lt.s32.totalorder %s4825_s4, %s4821_s3 }
  0x74   :  { %p4828_p12 = por %p4827_p11, %p4826_p10 }
  0x76   :  { %p4829_p13 = pnand %p4828_p12, %p4822_p9 }
  0x78   :  { %4832 = shalt.err (!%p4829_p13)
}
  0x79   :  { %94 = dma.hbm_to_vmem [thread:$0]  %s5154_s6, 16, %s92_s29, [#allocation12]  }
  0x7a   :  { %4855 = dma.done.wait [#allocation3], 128  }
  0x7b   :  { %4856 = vsyncadd [#allocation3], 4294967168 }
  0x7c   :  { %4857 = dma.done.wait [#allocation6], 7280  }
  0x7d   :  { %4858 = vsyncadd [#allocation6], 4294960016 }
  0x7e   :  { %4859 = dma.done.wait [#allocation9], 35920  }
  0x7f   :  { %4860 = vsyncadd [#allocation9], 4294931376 }
  0x80   :  { %4861 = dma.done.wait [#allocation12], 5136  }
  0x81   :  { %4862 = vsyncadd [#allocation12], 4294962160  ;;  %v4878_v0 = vmov 0   ;;  %v4162_v1 = vld [vmem:[#allocation5 + $0x4] ss:$28 sps:$4 sm:$0xff]   ;;  %v5021_v29 = vld [vmem:[#allocation2] sm:$0xff]  }
  0x82   :  { %546 = vmatprep.mubr.bf16.mxu0 %v4878_v0  ;;  %589 = vmatprep.mubr.bf16.mxu1 %v4878_v0  ;;  %v4164_v2 = vld [vmem:[#allocation5] ss:$28 sps:$4 sm:$0xff]   ;;  %v4167_v4 = vld [vmem:[#allocation5 + $0x38] ss:$28 sps:$4 sm:$0xff]   ;;  %v4170_v6 = vld [vmem:[#allocation5 + $0x70] ss:$28 sps:$4 sm:$0xff]  }
  0x83   :  { %514 = vmatprep.subr.bf16.mxu0 %v4162_v1  ;;  %v4165_v3 = vld [vmem:[#allocation5 + $0x3c] ss:$28 sps:$4 sm:$0xff]   ;;  %v4168_v5 = vld [vmem:[#allocation5 + $0x74] ss:$28 sps:$4 sm:$0xff]   ;;  %v4171_v7 = vld [vmem:[#allocation5 + $0xac] ss:$28 sps:$4 sm:$0xff]  }
  0x84   :  { %515 = vmatpush1.bf16.msra.mxu0 %v4164_v2  ;;  %v4173_v8 = vld [vmem:[#allocation5 + $0xa8] ss:$28 sps:$4 sm:$0xff]   ;;  %v4176_v13 = vld [vmem:[#allocation5 + $0xe0] ss:$28 sps:$4 sm:$0xff]   ;;  %v4179_v17 = vld [vmem:[#allocation5 + $0x118] ss:$28 sps:$4 sm:$0xff]  }
  0x85   :  { %516 = vmatprep.subr.bf16.mxu0 %v4165_v3  ;;  %v4174_v9 = vld [vmem:[#allocation5 + $0xe4] ss:$28 sps:$4 sm:$0xff]   ;;  %v4187_v10 = vld [vmem:[#allocation5 + $0xc] ss:$28 sps:$4 sm:$0xff]   ;;  %v4177_v15 = vld [vmem:[#allocation5 + $0x11c] ss:$28 sps:$4 sm:$0xff]  }
  0x86   :  { %v4189_v11 = vld [vmem:[#allocation5 + $0x8] ss:$28 sps:$4 sm:$0xff]   ;;  %557 = vmatprep.subr.bf16.mxu1 %v4187_v10  ;;  %v4192_v14 = vld [vmem:[#allocation5 + $0x40] ss:$28 sps:$4 sm:$0xff]   ;;  %v4195_v18 = vld [vmem:[#allocation5 + $0x78] ss:$28 sps:$4 sm:$0xff]  }
  0x87   :  { %v4190_v12 = vld [vmem:[#allocation5 + $0x44] ss:$28 sps:$4 sm:$0xff]   ;;  %558 = vmatpush1.bf16.msra.mxu1 %v4189_v11  ;;  %v4193_v16 = vld [vmem:[#allocation5 + $0x7c] ss:$28 sps:$4 sm:$0xff]   ;;  %v4180_v19 = vld [vmem:[#allocation5 + $0x154] ss:$28 sps:$4 sm:$0xff]  }
  0x88   :  { %517 = vmatpush1.bf16.msra.mxu0 %v4167_v4  ;;  %559 = vmatprep.subr.bf16.mxu1 %v4190_v12  ;;  %v4196_v20 = vld [vmem:[#allocation5 + $0xb4] ss:$28 sps:$4 sm:$0xff]   ;;  %v4183_v23 = vld [vmem:[#allocation5 + $0x18c] ss:$28 sps:$4 sm:$0xff]   ;;  %v4202_v27 = vld [vmem:[#allocation5 + $0x124] ss:$28 sps:$4 sm:$0xff]  }
  0x89   :  { %518 = vmatprep.subr.bf16.mxu0 %v4168_v5  ;;  %v4182_v21 = vld [vmem:[#allocation5 + $0x150] ss:$28 sps:$4 sm:$0xff]   ;;  %v4185_v25 = vld [vmem:[#allocation5 + $0x188] ss:$28 sps:$4 sm:$0xff]   ;;  %v4204_v30 = vld [vmem:[#allocation5 + $0x120] ss:$28 sps:$4 sm:$0xff]  }
  0x8a   :  { %v4198_v22 = vld [vmem:[#allocation5 + $0xb0] ss:$28 sps:$4 sm:$0xff]   ;;  %v4201_v26 = vld [vmem:[#allocation5 + $0xe8] ss:$28 sps:$4 sm:$0xff]   ;;  %v4205_v32 = vld [vmem:[#allocation5 + $0x15c] ss:$28 sps:$4 sm:$0xff]  }
  0x8b   :  { %560 = vmatpush1.bf16.msra.mxu1 %v4192_v14  ;;  %v4199_v24 = vld [vmem:[#allocation5 + $0xec] ss:$28 sps:$4 sm:$0xff]   ;;  %v4213_v28 = vld [vmem:[#allocation5 + $0x14] ss:$28 sps:$4 sm:$0xff]   ;;  %v4219_v37 = vld [vmem:[#allocation5 + $0x84] ss:$28 sps:$4 sm:$0xff]  }
  0x8c   :  { %519 = vmatpush1.bf16.msra.mxu0 %v4170_v6  ;;  %561 = vmatprep.subr.bf16.mxu1 %v4193_v16  ;;  %v4211_v31 = vld [vmem:[#allocation5 + $0x10] ss:$28 sps:$4 sm:$0xff]   ;;  %v4207_v34 = vld [vmem:[#allocation5 + $0x158] ss:$28 sps:$4 sm:$0xff]   ;;  %v4214_v36 = vld [vmem:[#allocation5 + $0x48] ss:$28 sps:$4 sm:$0xff]  }
  0x8d   :  { %520 = vmatprep.subr.bf16.mxu0 %v4171_v7  ;;  %v4216_v33 = vld [vmem:[#allocation5 + $0x4c] ss:$28 sps:$4 sm:$0xff]   ;;  %v4208_v35 = vld [vmem:[#allocation5 + $0x194] ss:$28 sps:$4 sm:$0xff]   ;;  %v4217_v39 = vld [vmem:[#allocation5 + $0x80] ss:$28 sps:$4 sm:$0xff]  }
  0x8e   :  { %v4210_v38 = vld [vmem:[#allocation5 + $0x190] ss:$28 sps:$4 sm:$0xff]   ;;  %v4222_v40 = vld [vmem:[#allocation5 + $0xbc] ss:$28 sps:$4 sm:$0xff]   ;;  %v4879_v44 = vmov 0.0   ;;  %vm4880_vm0 = vmmov 0  }
  0x8f   :  { %562 = vmatpush1.bf16.msra.mxu1 %v4195_v18  ;;  %v4220_v41 = vld [vmem:[#allocation5 + $0xb8] ss:$28 sps:$4 sm:$0xff]   ;;  %v4223_v45 = vld [vmem:[#allocation5 + $0xf0] ss:$28 sps:$4 sm:$0xff]   ;;  %v4226_v48 = vld [vmem:[#allocation5 + $0x128] ss:$28 sps:$4 sm:$0xff]  }
  0x90   :  { %521 = vmatpush1.bf16.msra.mxu0 %v4173_v8  ;;  %563 = vmatprep.subr.bf16.mxu1 %v4196_v20  ;;  %v4235_v42 = vld [vmem:[#allocation5 + $0x18] ss:$28 sps:$4 sm:$0xff]   ;;  %v4236_v46 = vld [vmem:[#allocation5 + $0x50] ss:$28 sps:$4 sm:$0xff]   ;;  %v4237_v49 = vld [vmem:[#allocation5 + $0x88] ss:$28 sps:$4 sm:$0xff]  }
  0x91   :  { %522 = vmatprep.subr.bf16.mxu0 %v4174_v9  ;;  %v4225_v43 = vld [vmem:[#allocation5 + $0xf4] ss:$28 sps:$4 sm:$0xff]   ;;  %v4228_v47 = vld [vmem:[#allocation5 + $0x12c] ss:$28 sps:$4 sm:$0xff]   ;;  %v4231_v50 = vld [vmem:[#allocation5 + $0x164] ss:$28 sps:$4 sm:$0xff]  }
  0x92   :  { %v4229_v51 = vld [vmem:[#allocation5 + $0x160] ss:$28 sps:$4 sm:$0xff]   ;;  %v4232_v54 = vld [vmem:[#allocation5 + $0x198] ss:$28 sps:$4 sm:$0xff]   ;;  %v4240_v57 = vld [vmem:[#allocation5 + $0x130] ss:$28 sps:$4 sm:$0xff]  }
  0x93   :  { %564 = vmatpush1.bf16.msra.mxu1 %v4198_v22  ;;  %v4238_v52 = vld [vmem:[#allocation5 + $0xc0] ss:$28 sps:$4 sm:$0xff]   ;;  %v4239_v55 = vld [vmem:[#allocation5 + $0xf8] ss:$28 sps:$4 sm:$0xff]   ;;  %v4241_v60 = vld [vmem:[#allocation5 + $0x168] ss:$28 sps:$4 sm:$0xff]  }
  0x94   :  { %523 = vmatpush1.bf16.msra.mxu0 %v4176_v13  ;;  %565 = vmatprep.subr.bf16.mxu1 %v4199_v24  ;;  %v4234_v53 = vld [vmem:[#allocation5 + $0x19c] ss:$28 sps:$4 sm:$0xff]   ;;  %v4245_v56 = vld [vmem:[#allocation8 + $0x4] ss:$20 sps:$4 sm:$0xff]   ;;  %v4251_v59 = vld [vmem:[#allocation8 + $0x2c] ss:$20 sps:$4 sm:$0xff]  }
  0x95   :  { %524 = vmatprep.subr.bf16.mxu0 %v4177_v15  ;;  %v4243_v58 = vld [vmem:[#allocation8] ss:$20 sps:$4 sm:$0xff]   ;;  %v4249_v61 = vld [vmem:[#allocation8 + $0x28] ss:$20 sps:$4 sm:$0xff]   ;;  %v4255_v1 = vld [vmem:[#allocation8 + $0x50] ss:$20 sps:$4 sm:$0xff]  }
  0x96   :  { %v4257_v62 = vld [vmem:[#allocation8 + $0x54] ss:$20 sps:$4 sm:$0xff]   ;;  %v4248_v2 = vld [vmem:[#allocation8 + $0xc] ss:$20 sps:$4 sm:$0xff]   ;;  %v4263_v3 = vld [vmem:[#allocation8 + $0x7c] ss:$20 sps:$4 sm:$0xff]  }
  0x97   :  { %566 = vmatpush1.bf16.msra.mxu1 %v4201_v26  ;;  %v4242_v63 = vld [vmem:[#allocation5 + $0x1a0] ss:$28 sps:$4 sm:$0xff]   ;;  %v4246_v4 = vld [vmem:[#allocation8 + $0x8] ss:$20 sps:$4 sm:$0xff]   ;;  %v4252_v8 = vld [vmem:[#allocation8 + $0x30] ss:$20 sps:$4 sm:$0xff]  }
  0x98   :  { %525 = vmatpush1.bf16.msra.mxu0 %v4179_v17  ;;  %567 = vmatprep.subr.bf16.mxu1 %v4202_v27  ;;  %v4261_v5 = vld [vmem:[#allocation8 + $0x78] ss:$20 sps:$4 sm:$0xff]   ;;  %v4254_v6 = vld [vmem:[#allocation8 + $0x34] ss:$20 sps:$4 sm:$0xff]   ;;  %v4260_v9 = vld [vmem:[#allocation8 + $0x5c] ss:$20 sps:$4 sm:$0xff]  }
  0x99   :  { %526 = vmatprep.subr.bf16.mxu0 %v4180_v19  ;;  %v4269_v7 = vld [vmem:[#allocation8 + $0xa4] ss:$20 sps:$4 sm:$0xff]   ;;  %v4267_v10 = vld [vmem:[#allocation8 + $0xa0] ss:$20 sps:$4 sm:$0xff]   ;;  %v4273_v13 = vld [vmem:[#allocation8 + $0xc8] ss:$20 sps:$4 sm:$0xff]  }
  0x9a   :  { %v4275_v11 = vld [vmem:[#allocation8 + $0xcc] ss:$20 sps:$4 sm:$0xff]   ;;  %v4266_v14 = vld [vmem:[#allocation8 + $0x84] ss:$20 sps:$4 sm:$0xff]   ;;  %v4281_v15 = vld [vmem:[#allocation8 + $0xf4] ss:$20 sps:$4 sm:$0xff]  }
  0x9b   :  { %568 = vmatpush1.bf16.msra.mxu1 %v4204_v30  ;;  %v4258_v12 = vld [vmem:[#allocation8 + $0x58] ss:$20 sps:$4 sm:$0xff]   ;;  %v4264_v16 = vld [vmem:[#allocation8 + $0x80] ss:$20 sps:$4 sm:$0xff]   ;;  %v4279_v17 = vld [vmem:[#allocation8 + $0xf0] ss:$20 sps:$4 sm:$0xff]  }
  0x9c   :  { %527 = vmatpush1.bf16.msra.mxu0 %v4182_v21  ;;  %569 = vmatprep.subr.bf16.mxu1 %v4205_v32  ;;  %v4272_v18 = vld [vmem:[#allocation8 + $0xac] ss:$20 sps:$4 sm:$0xff]   ;;  %v4287_v19 = vld [vmem:[#allocation8 + $0x11c] ss:$20 sps:$4 sm:$0xff]   ;;  %v4278_v22 = vld [vmem:[#allocation8 + $0xd4] ss:$20 sps:$4 sm:$0xff]  }
  0x9d   :  { %528 = vmatprep.subr.bf16.mxu0 %v4183_v23  ;;  %v4270_v20 = vld [vmem:[#allocation8 + $0xa8] ss:$20 sps:$4 sm:$0xff]   ;;  %v4285_v21 = vld [vmem:[#allocation8 + $0x118] ss:$20 sps:$4 sm:$0xff]   ;;  %v4276_v24 = vld [vmem:[#allocation8 + $0xd0] ss:$20 sps:$4 sm:$0xff]  }
  0x9e   :  { %v4293_v23 = vld [vmem:[#allocation8 + $0x144] ss:$20 sps:$4 sm:$0xff]   ;;  %v4284_v26 = vld [vmem:[#allocation8 + $0xfc] ss:$20 sps:$4 sm:$0xff]   ;;  %v4299_v27 = vld [vmem:[#allocation8 + $0x16c] ss:$20 sps:$4 sm:$0xff]  }
  0x9f   :  { %570 = vmatpush1.bf16.msra.mxu1 %v4207_v34  ;;  %v4290_v30 = vld [vmem:[#allocation8 + $0x124] ss:$20 sps:$4 sm:$0xff]   ;;  %v4288_v32 = vld [vmem:[#allocation8 + $0x120] ss:$20 sps:$4 sm:$0xff]   ;;  %s4881_s6 = smov [#allocation14]  }
  0xa0   :  { %529 = vmatpush1.bf16.msra.mxu0 %v4185_v25  ;;  %571 = vmatprep.subr.bf16.mxu1 %v4208_v35  ;;  %v4291_v25 = vld [vmem:[#allocation8 + $0x140] ss:$20 sps:$4 sm:$0xff]   ;;  %v4311_v35 = vld [vmem:[#allocation8 + $0x1bc] ss:$20 sps:$4 sm:$0xff]   ;;  %s3514_s8 = sshll.u32 %s4881_s6, 4  ;;  %s3515_s8 = int_to_ptr.vmem [resolvable:$true] %s3514_s8 }
  0xa1   :  { %600 = vmatprep.subr.bf16.mxu0 %v4213_v28  ;;  %v4282_v28 = vld [vmem:[#allocation8 + $0xf8] ss:$20 sps:$4 sm:$0xff]   ;;  %s4833_s18 = scalar_lea.vmem %s3515_s8, 128  ;;  %p4838_p1 = scmp.lt.s32.totalorder %s3515_s8, %s3515_s8 }
  0xa2   :  { %v4296_v34 = vld [vmem:[#allocation8 + $0x14c] ss:$20 sps:$4 sm:$0xff]   ;;  %p4834_p0 = scmp.ne.s32.totalorder %s3515_s8, %s4833_s18  ;;  %p4839_p2 = scmp.lt.s32.totalorder %s4833_s18, %s4833_s18 }
  0xa3   :  { %547 = vmatmul.mubr.bf16.vlgmr.msra.gmra.mrb[0].mxu0 %v5021_v29  ;;  %572 = vmatpush1.bf16.msra.mxu1 %v4210_v38  ;;  %v4302_v38 = vld [vmem:[#allocation8 + $0x174] ss:$20 sps:$4 sm:$0xff]  }
  0xa4   :  { %601 = vmatpush1.bf16.msra.mxu0 %v4211_v31  ;;  %632 = vmatprep.mubr.bf16.mxu0 %v4878_v0  ;;  %v4305_v31 = vld [vmem:[#allocation8 + $0x194] ss:$20 sps:$4 sm:$0xff]   ;;  %p4840_p3 = por %p4839_p2, %p4838_p1 }
  0xa5   :  { %602 = vmatprep.subr.bf16.mxu0 %v4216_v33  ;;  %4053 = vmatprep.subr.bf16.mxu1 %v4879_v44  ;;  %v4303_v33 = vld [vmem:[#allocation8 + $0x190] ss:$20 sps:$4 sm:$0xff]  }
  0xa6   :  { %590 = vmatmul.mubr.bf16.vlgmr.msra.gmra.mrb[0].mxu1 %v5021_v29  ;;  %p4841_p4 = pnand %p4840_p3, %p4834_p0 }
  0xa7   :  { %4054 = vmatpush3.bf16.msra.mxu1 %v4235_v42  ;;  %4069 = vmatprep.mubr.msk.bf16.mxu1 %vm4880_vm0, %v4879_v44  ;;  %v4308_v42 = vld [vmem:[#allocation8 + $0x19c] ss:$20 sps:$4 sm:$0xff]  }
  0xa8   :  { %603 = vmatpush1.bf16.msra.mxu0 %v4214_v36  ;;  %4055 = vmatprep.subr.bf16.mxu1 %v4879_v44  ;;  %v4294_v36 = vld [vmem:[#allocation8 + $0x148] ss:$20 sps:$4 sm:$0xff]  }
  0xa9   :  { %604 = vmatprep.subr.bf16.mxu0 %v4219_v37  ;;  %v4309_v37 = vld [vmem:[#allocation8 + $0x1b8] ss:$20 sps:$4 sm:$0xff]  }
  0xab   :  { %4056 = vmatpush3.bf16.msra.mxu1 %v4236_v46  ;;  %v4321_v46 = vld [vmem:[#allocation8 + $0x208] ss:$20 sps:$4 sm:$0xff]  }
  0xac   :  { %605 = vmatpush1.bf16.msra.mxu0 %v4217_v39  ;;  %4057 = vmatprep.subr.bf16.mxu1 %v4879_v44  ;;  %v4317_v39 = vld [vmem:[#allocation8 + $0x1e4] ss:$20 sps:$4 sm:$0xff]  }
  0xad   :  { %606 = vmatprep.subr.bf16.mxu0 %v4222_v40  ;;  %v4300_v40 = vld [vmem:[#allocation8 + $0x170] ss:$20 sps:$4 sm:$0xff]  }
  0xaf   :  { %4058 = vmatpush3.bf16.msra.mxu1 %v4237_v49  ;;  %v4329_v49 = vld [vmem:[#allocation8 + $0x234] ss:$20 sps:$4 sm:$0xff]  }
  0xb0   :  { %607 = vmatpush1.bf16.msra.mxu0 %v4220_v41  ;;  %4059 = vmatprep.subr.bf16.mxu1 %v4879_v44  ;;  %v4315_v41 = vld [vmem:[#allocation8 + $0x1e0] ss:$20 sps:$4 sm:$0xff]  }
  0xb1   :  { %608 = vmatprep.subr.bf16.mxu0 %v4225_v43  ;;  %v4323_v43 = vld [vmem:[#allocation8 + $0x20c] ss:$20 sps:$4 sm:$0xff]  }
  0xb3   :  { %4060 = vmatpush3.bf16.msra.mxu1 %v4238_v52  ;;  %v4318_v52 = vld [vmem:[#allocation8 + $0x1e8] ss:$20 sps:$4 sm:$0xff]  }
  0xb4   :  { %609 = vmatpush1.bf16.msra.mxu0 %v4223_v45  ;;  %4061 = vmatprep.subr.bf16.mxu1 %v4879_v44  ;;  %v4306_v45 = vld [vmem:[#allocation8 + $0x198] ss:$20 sps:$4 sm:$0xff]  }
  0xb5   :  { %610 = vmatprep.subr.bf16.mxu0 %v4228_v47  ;;  %v4314_v47 = vld [vmem:[#allocation8 + $0x1c4] ss:$20 sps:$4 sm:$0xff]  }
  0xb7   :  { %4062 = vmatpush3.bf16.msra.mxu1 %v4239_v55  ;;  %v4333_v55 = vld [vmem:[#allocation8 + $0x258] ss:$20 sps:$4 sm:$0xff]  }
  0xb8   :  { %611 = vmatpush1.bf16.msra.mxu0 %v4226_v48  ;;  %4063 = vmatprep.subr.bf16.mxu1 %v4879_v44  ;;  %v4312_v48 = vld [vmem:[#allocation8 + $0x1c0] ss:$20 sps:$4 sm:$0xff]  }
  0xb9   :  { %612 = vmatprep.subr.bf16.mxu0 %v4231_v50  ;;  %v4320_v50 = vld [vmem:[#allocation8 + $0x1ec] ss:$20 sps:$4 sm:$0xff]  }
  0xbb   :  { %4064 = vmatpush3.bf16.msra.mxu1 %v4240_v57  ;;  %v4324_v57 = vld [vmem:[#allocation8 + $0x210] ss:$20 sps:$4 sm:$0xff]  }
  0xbc   :  { %613 = vmatpush1.bf16.msra.mxu0 %v4229_v51  ;;  %4065 = vmatprep.subr.bf16.mxu1 %v4879_v44  ;;  %v4327_v51 = vld [vmem:[#allocation8 + $0x230] ss:$20 sps:$4 sm:$0xff]  }
  0xbd   :  { %614 = vmatprep.subr.bf16.mxu0 %v4234_v53  ;;  %v4335_v53 = vld [vmem:[#allocation8 + $0x25c] ss:$20 sps:$4 sm:$0xff]  }
  0xbf   :  { %4066 = vmatpush3.bf16.msra.mxu1 %v4241_v60  ;;  %v4338_v60 = vld [vmem:[#allocation8 + $0x264] ss:$20 sps:$4 sm:$0xff]  }
  0xc0   :  { %615 = vmatpush1.bf16.msra.mxu0 %v4232_v54  ;;  %4067 = vmatprep.subr.bf16.mxu1 %v4879_v44  ;;  %v4326_v54 = vld [vmem:[#allocation8 + $0x214] ss:$20 sps:$4 sm:$0xff]  }
  0xc1   :  { %2524 = vmatprep.subr.bf16.mxu0 %v4245_v56  ;;  %v4341_v56 = vld [vmem:[#allocation8 + $0x284] ss:$20 sps:$4 sm:$0xff]  }
  0xc3   :  { %633 = vmatmul.mubr.bf16.vlgmr.msra.gmra.mrb[4].mxu0 %v5021_v29  ;;  %4068 = vmatpush3.bf16.msra.mxu1 %v4242_v63  ;;  %v185_v63 = vlaneseq }
  0xc4   :  { %2525 = vmatpush1.bf16.msra.mxu0 %v4243_v58  ;;  %2696 = vmatprep.subr.bf16.mxu1 %v4248_v2  ;;  %v4332_v58 = vld [vmem:[#allocation8 + $0x23c] ss:$20 sps:$4 sm:$0xff]  }
  0xc5   :  { %2526 = vmatprep.subr.bf16.mxu0 %v4251_v59  ;;  %v4330_v59 = vld [vmem:[#allocation8 + $0x238] ss:$20 sps:$4 sm:$0xff]  }
  0xc6   :  { %4070 = vmatmul.mubr.bf16.vlgmr.msra.gmra.mrb[4].mxu1 %v5021_v29  ;;  %v4297_v29 = vld [vmem:[#allocation8 + $0x168] ss:$20 sps:$4 sm:$0xff]  }
  0xc7   :  { %2697 = vmatpush1.bf16.msra.mxu1 %v4246_v4  ;;  %v5040_v2 = vld [vmem:[#allocation7] sm:$0xff] }
  0xc8   :  { %2527 = vmatpush1.bf16.msra.mxu0 %v4249_v61  ;;  %2698 = vmatprep.subr.bf16.mxu1 %v4254_v6  ;;  %v4336_v61 = vld [vmem:[#allocation8 + $0x260] ss:$20 sps:$4 sm:$0xff]  }
  0xc9   :  { %2528 = vmatprep.subr.bf16.mxu0 %v4257_v62  ;;  %v4344_v62 = vld [vmem:[#allocation8 + $0x28c] ss:$20 sps:$4 sm:$0xff]  }
  0xcb   :  { %2699 = vmatpush1.bf16.msra.mxu1 %v4252_v8 }
  0xcc   :  { %2529 = vmatpush1.bf16.msra.mxu0 %v4255_v1  ;;  %2700 = vmatprep.subr.bf16.mxu1 %v4260_v9  ;;  %v5038_v1 = vshrl.u32 %v185_v63, 7  ;;  %v4372_v63 = vld [vmem:[#allocation8 + $0x350] ss:$20 sps:$4 sm:$0xff]  }
  0xcd   :  { %2530 = vmatprep.subr.bf16.mxu0 %v4263_v3 }
  0xce   :  { %v187_v3 = vsub.s32 0, %v5038_v1  ;;  %v191_v4 = vsub.s32 1, %v5038_v1 }
  0xcf   :  { %2701 = vmatpush1.bf16.msra.mxu1 %v4258_v12 }
  0xd0   :  { %2531 = vmatpush1.bf16.msra.mxu0 %v4261_v5  ;;  %2702 = vmatprep.subr.bf16.mxu1 %v4266_v14  ;;  %v188_v5 = vrot.slane %v5040_v2, %v187_v3  ;;  %v192_v6 = vrot.slane %v5040_v2, %v191_v4 }
  0xd1   :  { %2532 = vmatprep.subr.bf16.mxu0 %v4269_v7 }
  0xd3   :  { %2703 = vmatpush1.bf16.msra.mxu1 %v4264_v16 }
  0xd4   :  { %2533 = vmatpush1.bf16.msra.mxu0 %v4267_v10  ;;  %2704 = vmatprep.subr.bf16.mxu1 %v4272_v18 }
  0xd5   :  { %2534 = vmatprep.subr.bf16.mxu0 %v4275_v11 }
  0xd7   :  { %2705 = vmatpush1.bf16.msra.mxu1 %v4270_v20  ;;  %v199_v20 = vsub.s32 3, %v5038_v1 }
  0xd8   :  { %2535 = vmatpush1.bf16.msra.mxu0 %v4273_v13  ;;  %2706 = vmatprep.subr.bf16.mxu1 %v4278_v22 }
  0xd9   :  { %2536 = vmatprep.subr.bf16.mxu0 %v4281_v15 }
  0xdb   :  { %2707 = vmatpush1.bf16.msra.mxu1 %v4276_v24  ;;  %v4342_v24 = vld [vmem:[#allocation8 + $0x288] ss:$20 sps:$4 sm:$0xff]  }
  0xdc   :  { %2537 = vmatpush1.bf16.msra.mxu0 %v4279_v17  ;;  %2708 = vmatprep.subr.bf16.mxu1 %v4284_v26  ;;  %v195_v17 = vsub.s32 2, %v5038_v1  ;;  %v4350_v26 = vld [vmem:[#allocation8 + $0x2b4] ss:$20 sps:$4 sm:$0xff]  }
  0xdd   :  { %2538 = vmatprep.subr.bf16.mxu0 %v4287_v19 }
  0xdf   :  { %2709 = vmatpush1.bf16.msra.mxu1 %v4282_v28  ;;  %v200_v28 = vrot.slane %v5040_v2, %v199_v20 }
  0xe0   :  { %2539 = vmatpush1.bf16.msra.mxu0 %v4285_v21  ;;  %2710 = vmatprep.subr.bf16.mxu1 %v4290_v30  ;;  %v4348_v30 = vld [vmem:[#allocation8 + $0x2b0] ss:$20 sps:$4 sm:$0xff]  }
  0xe1   :  { %2540 = vmatprep.subr.bf16.mxu0 %v4293_v23  ;;  %v4339_v23 = vld [vmem:[#allocation8 + $0x280] ss:$20 sps:$4 sm:$0xff]  }
  0xe3   :  { %2711 = vmatpush1.bf16.msra.mxu1 %v4288_v32  ;;  %v4353_v32 = vld [vmem:[#allocation8 + $0x2d4] ss:$20 sps:$4 sm:$0xff]  }
  0xe4   :  { %2541 = vmatpush1.bf16.msra.mxu0 %v4291_v25  ;;  %2712 = vmatprep.subr.bf16.mxu1 %v4296_v34  ;;  %v4347_v25 = vld [vmem:[#allocation8 + $0x2ac] ss:$20 sps:$4 sm:$0xff]  }
  0xe5   :  { %2542 = vmatprep.subr.bf16.mxu0 %v4299_v27  ;;  %v196_v27 = vrot.slane %v5040_v2, %v195_v17 }
  0xe7   :  { %2713 = vmatpush1.bf16.msra.mxu1 %v4294_v36 }
  0xe8   :  { %2543 = vmatpush1.bf16.msra.mxu0 %v4297_v29  ;;  %2714 = vmatprep.subr.bf16.mxu1 %v4302_v38  ;;  %v4345_v29 = vld [vmem:[#allocation8 + $0x2a8] ss:$20 sps:$4 sm:$0xff]  }
  0xe9   :  { %2544 = vmatprep.subr.bf16.mxu0 %v4305_v31 }
  0xeb   :  { %2715 = vmatpush1.bf16.msra.mxu1 %v4300_v40 }
  0xec   :  { %2545 = vmatpush1.bf16.msra.mxu0 %v4303_v33  ;;  %2716 = vmatprep.subr.bf16.mxu1 %v4308_v42  ;;  %v4356_v33 = vld [vmem:[#allocation8 + $0x2dc] ss:$20 sps:$4 sm:$0xff]   ;;  %v4354_v42 = vld [vmem:[#allocation8 + $0x2d8] ss:$20 sps:$4 sm:$0xff]  }
  0xed   :  { %2546 = vmatprep.subr.bf16.mxu0 %v4311_v35 }
  0xef   :  { %2717 = vmatpush1.bf16.msra.mxu1 %v4306_v45 }
  0xf0   :  { %2547 = vmatpush1.bf16.msra.mxu0 %v4309_v37  ;;  %2718 = vmatprep.subr.bf16.mxu1 %v4314_v47  ;;  %v4362_v47 = vld [vmem:[#allocation8 + $0x304] ss:$20 sps:$4 sm:$0xff]  }
  0xf1   :  { %2548 = vmatprep.subr.bf16.mxu0 %v4317_v39 }
  0xf3   :  { %2719 = vmatpush1.bf16.msra.mxu1 %v4312_v48 }
  0xf4   :  { %2549 = vmatpush1.bf16.msra.mxu0 %v4315_v41  ;;  %2720 = vmatprep.subr.bf16.mxu1 %v4320_v50  ;;  %v4351_v41 = vld [vmem:[#allocation8 + $0x2d0] ss:$20 sps:$4 sm:$0xff]  }
  0xf5   :  { %2550 = vmatprep.subr.bf16.mxu0 %v4323_v43 }
  0xf7   :  { %2721 = vmatpush1.bf16.msra.mxu1 %v4318_v52  ;;  %v4360_v52 = vld [vmem:[#allocation8 + $0x300] ss:$20 sps:$4 sm:$0xff]  }
  0xf8   :  { %2551 = vmatpush1.bf16.msra.mxu0 %v4321_v46  ;;  %2722 = vmatprep.subr.bf16.mxu1 %v4326_v54  ;;  %v4359_v46 = vld [vmem:[#allocation8 + $0x2fc] ss:$20 sps:$4 sm:$0xff]   ;;  %v4365_v54 = vld [vmem:[#allocation8 + $0x324] ss:$20 sps:$4 sm:$0xff]  }
  0xf9   :  { %2552 = vmatprep.subr.bf16.mxu0 %v4329_v49 }
  0xfb   :  { %2723 = vmatpush1.bf16.msra.mxu1 %v4324_v57  ;;  %v4366_v57 = vld [vmem:[#allocation8 + $0x328] ss:$20 sps:$4 sm:$0xff]  }
  0xfc   :  { %2553 = vmatpush1.bf16.msra.mxu0 %v4327_v51  ;;  %2724 = vmatprep.subr.bf16.mxu1 %v4332_v58  ;;  %v4357_v51 = vld [vmem:[#allocation8 + $0x2f8] ss:$20 sps:$4 sm:$0xff]  }
  0xfd   :  { %2554 = vmatprep.subr.bf16.mxu0 %v4335_v53  ;;  %v4371_v58 = vld [vmem:[#allocation8 + $0x34c] ss:$20 sps:$4 sm:$0xff]  }
  0xff   :  { %2725 = vmatpush1.bf16.msra.mxu1 %v4330_v59  ;;  %v4374_v59 = vld [vmem:[#allocation8 + $0x354] ss:$20 sps:$4 sm:$0xff]  }
 0x100   :  { %2555 = vmatpush1.bf16.msra.mxu0 %v4333_v55  ;;  %2726 = vmatprep.subr.bf16.mxu1 %v4338_v60  ;;  %v4368_v55 = vld [vmem:[#allocation8 + $0x32c] ss:$20 sps:$4 sm:$0xff]   ;;  %v203_v60 = vsub.s32 4, %v5038_v1 }
 0x101   :  { %2567 = vmatprep.subr.bf16.mxu0 %v4341_v56  ;;  %v4363_v56 = vld [vmem:[#allocation8 + $0x320] ss:$20 sps:$4 sm:$0xff]  }
 0x103   :  { %2727 = vmatpush1.bf16.msra.mxu1 %v4336_v61  ;;  %v207_v61 = vsub.s32 5, %v5038_v1 }
 0x104   :  { %2739 = vmatprep.subr.bf16.mxu1 %v4344_v62  ;;  %v4369_v62 = vld [vmem:[#allocation8 + $0x348] ss:$20 sps:$4 sm:$0xff]  }
 0x176   :  { %v548_v7 = vpop.f32.mrb[0].mxu0 }
 0x177   :  { %v549_v8 = vadd.f32 %v548_v7, %v188_v5  ;;  %v550_v9 = vpop.f32.mrb[1].mxu0  ;;  %v204_v7 = vrot.slane %v5040_v2, %v203_v60 }
 0x178   :  { %v551_v10 = vadd.f32 %v550_v9, %v192_v6  ;;  %v552_v11 = vpop.f32.mrb[2].mxu0  ;;  %v4375_v9 = vld [vmem:[#allocation8 + $0x370] ss:$20 sps:$4 sm:$0xff]  }
 0x179   :  { %v553_v12 = vadd.f32 %v552_v11, %v188_v5  ;;  %v554_v13 = vpop.f32.mrb[3].mxu0  ;;  %v684_v15 = vmax.f32 %v549_v8, 0.0  ;;  %v591_v31 = vpop.f32.mrb[0].mxu1  ;;  %v4377_v5 = vld [vmem:[#allocation8 + $0x374] ss:$20 sps:$4 sm:$0xff]   ;;  %v208_v8 = vrot.slane %v5040_v2, %v207_v61 }
 0x17a   :  { %v555_v14 = vadd.f32 %v554_v13, %v192_v6  ;;  %v685_v18 = vmax.f32 %v551_v10, 0.0  ;;  %v592_v34 = vadd.f32 %v591_v31, %v196_v27  ;;  %v593_v35 = vpop.f32.mrb[1].mxu1  ;;  %v4380_v6 = vld [vmem:[#allocation8 + $0x37c] ss:$20 sps:$4 sm:$0xff]   ;;  %v4378_v10 = vld [vmem:[#allocation8 + $0x378] ss:$20 sps:$4 sm:$0xff]  }
 0x17b   :  { %v691_v16 = vmax.f32 %v553_v12, 0.0  ;;  %v594_v36 = vadd.f32 %v593_v35, %v200_v28  ;;  %v595_v37 = vpop.f32.mrb[2].mxu1  ;;  %v4383_v12 = vld [vmem:[#allocation8 + $0x39c] ss:$20 sps:$4 sm:$0xff]   ;;  %v4386_v13 = vld [vmem:[#allocation8 + $0x3a4] ss:$20 sps:$4 sm:$0xff]  }
 0x17c   :  { %v692_v19 = vmax.f32 %v555_v14, 0.0  ;;  %v686_v38 = vmax.f32 %v592_v34, 0.0  ;;  %v596_v39 = vadd.f32 %v595_v37, %v196_v27  ;;  %v597_v40 = vpop.f32.mrb[3].mxu1  ;;  %v4387_v35 = vld [vmem:[#allocation8 + $0x3c0] ss:$20 sps:$4 sm:$0xff]  }
 0x17d   :  { %v5052_v21 = vpack.c.bf16 %v691_v16, %v684_v15  ;;  %v687_v43 = vmax.f32 %v594_v36, 0.0  ;;  %v598_v45 = vadd.f32 %v597_v40, %v200_v28  ;;  %v4390_v36 = vld [vmem:[#allocation8 + $0x3c8] ss:$20 sps:$4 sm:$0xff]   ;;  %v4405_v61 = vld [vmem:[#allocation8 + $0x438] ss:$20 sps:$4 sm:$0xff]  }
 0x17e   :  { %v5054_v22 = vpack.c.bf16 %v692_v19, %v685_v18  ;;  %v693_v48 = vmax.f32 %v596_v39, 0.0  ;;  %v4398_v39 = vld [vmem:[#allocation8 + $0x3f4] ss:$20 sps:$4 sm:$0xff]  }
 0x17f   :  { %v694_v49 = vmax.f32 %v598_v45, 0.0  ;;  %v4401_v45 = vld [vmem:[#allocation8 + $0x414] ss:$20 sps:$4 sm:$0xff]  }
 0x180   :  { %2556 = vmatprep.mubr.bf16.mxu0 %v5054_v22  ;;  %2728 = vmatprep.mubr.bf16.mxu1 %v5054_v22  ;;  %v5066_v50 = vpack.c.bf16 %v693_v48, %v686_v38  ;;  %v4395_v38 = vld [vmem:[#allocation8 + $0x3ec] ss:$20 sps:$4 sm:$0xff]  }
 0x181   :  { %2557 = vmatmul.mubr.bf16.vlgmr.msra.gmra.mrb[8].mxu0 %v5052_v21  ;;  %2729 = vmatmul.mubr.bf16.vlgmr.msra.gmra.mrb[8].mxu1 %v5052_v21  ;;  %v5068_v53 = vpack.c.bf16 %v694_v49, %v687_v43 }
 0x182   :  { %2568 = vmatpush1.bf16.msra.mxu0 %v4339_v23  ;;  %2740 = vmatpush1.bf16.msra.mxu1 %v4342_v24 }
 0x183   :  { %2569 = vmatprep.subr.bf16.mxu0 %v4347_v25  ;;  %2741 = vmatprep.subr.bf16.mxu1 %v4350_v26  ;;  %v4381_v25 = vld [vmem:[#allocation8 + $0x398] ss:$20 sps:$4 sm:$0xff]   ;;  %v4384_v26 = vld [vmem:[#allocation8 + $0x3a0] ss:$20 sps:$4 sm:$0xff]  }
 0x184   :  { %2599 = vmatprep.mubr.bf16.mxu0 %v5068_v53  ;;  %2771 = vmatprep.mubr.bf16.mxu1 %v5068_v53 }
 0x186   :  { %2570 = vmatpush1.bf16.msra.mxu0 %v4345_v29  ;;  %2742 = vmatpush1.bf16.msra.mxu1 %v4348_v30  ;;  %v4389_v29 = vld [vmem:[#allocation8 + $0x3c4] ss:$20 sps:$4 sm:$0xff]   ;;  %v4392_v30 = vld [vmem:[#allocation8 + $0x3cc] ss:$20 sps:$4 sm:$0xff]  }
 0x187   :  { %2571 = vmatprep.subr.bf16.mxu0 %v4353_v32  ;;  %2743 = vmatprep.subr.bf16.mxu1 %v4356_v33  ;;  %v211_v32 = vsub.s32 6, %v5038_v1 }
 0x189   :  { %v212_v40 = vrot.slane %v5040_v2, %v211_v32  ;;  %v4407_v2 = vld [vmem:[#allocation8 + $0x43c] ss:$20 sps:$4 sm:$0xff]   ;;  %v4449_v32 = vld [vmem:[#allocation8 + $0x554] ss:$20 sps:$4 sm:$0xff]  }
 0x18a   :  { %2572 = vmatpush1.bf16.msra.mxu0 %v4351_v41  ;;  %2744 = vmatpush1.bf16.msra.mxu1 %v4354_v42  ;;  %v4393_v41 = vld [vmem:[#allocation8 + $0x3e8] ss:$20 sps:$4 sm:$0xff]   ;;  %v4396_v42 = vld [vmem:[#allocation8 + $0x3f0] ss:$20 sps:$4 sm:$0xff]  }
 0x18b   :  { %2573 = vmatprep.subr.bf16.mxu0 %v4359_v46  ;;  %2745 = vmatprep.subr.bf16.mxu1 %v4362_v47  ;;  %v4404_v46 = vld [vmem:[#allocation8 + $0x41c] ss:$20 sps:$4 sm:$0xff]  }
 0x18e   :  { %2574 = vmatpush1.bf16.msra.mxu0 %v4357_v51  ;;  %2746 = vmatpush1.bf16.msra.mxu1 %v4360_v52 }
 0x18f   :  { %2575 = vmatprep.subr.bf16.mxu0 %v4365_v54  ;;  %2747 = vmatprep.subr.bf16.mxu1 %v4368_v55  ;;  %v4399_v55 = vld [vmem:[#allocation8 + $0x410] ss:$20 sps:$4 sm:$0xff]  }
 0x192   :  { %2576 = vmatpush1.bf16.msra.mxu0 %v4363_v56  ;;  %2748 = vmatpush1.bf16.msra.mxu1 %v4366_v57  ;;  %v4402_v56 = vld [vmem:[#allocation8 + $0x418] ss:$20 sps:$4 sm:$0xff]  }
 0x193   :  { %2577 = vmatprep.subr.bf16.mxu0 %v4371_v58  ;;  %2749 = vmatprep.subr.bf16.mxu1 %v4374_v59  ;;  %v4410_v57 = vld [vmem:[#allocation8 + $0x444] ss:$20 sps:$4 sm:$0xff]  }
 0x196   :  { %2578 = vmatpush1.bf16.msra.mxu0 %v4369_v62  ;;  %2750 = vmatpush1.bf16.msra.mxu1 %v4372_v63  ;;  %v634_v11 = vpop.f32.mrb[4].mxu0  ;;  %v4408_v62 = vld [vmem:[#allocation8 + $0x440] ss:$20 sps:$4 sm:$0xff]   ;;  %v4413_v63 = vld [vmem:[#allocation8 + $0x464] ss:$20 sps:$4 sm:$0xff]  }
 0x197   :  { %2579 = vmatprep.subr.bf16.mxu0 %v4377_v5  ;;  %2751 = vmatprep.subr.bf16.mxu1 %v4380_v6  ;;  %v635_v14 = vadd.f32 %v634_v11, %v204_v7  ;;  %v636_v15 = vpop.f32.mrb[5].mxu0  ;;  %v4416_v5 = vld [vmem:[#allocation8 + $0x46c] ss:$20 sps:$4 sm:$0xff]   ;;  %v4420_v11 = vld [vmem:[#allocation8 + $0x490] ss:$20 sps:$4 sm:$0xff]  }
 0x198   :  { %v637_v16 = vadd.f32 %v636_v15, %v208_v8  ;;  %v638_v18 = vpop.f32.mrb[6].mxu0  ;;  %v4411_v6 = vld [vmem:[#allocation8 + $0x460] ss:$20 sps:$4 sm:$0xff]   ;;  %v4426_v15 = vld [vmem:[#allocation8 + $0x4b8] ss:$20 sps:$4 sm:$0xff]  }
 0x199   :  { %v688_v19 = vmax.f32 %v635_v14, 0.0  ;;  %v639_v23 = vadd.f32 %v638_v18, %v204_v7  ;;  %v640_v24 = vpop.f32.mrb[7].mxu0  ;;  %v677_v43 = vpop.f32.mrb[4].mxu1  ;;  %v4414_v7 = vld [vmem:[#allocation8 + $0x468] ss:$20 sps:$4 sm:$0xff]  }
 0x19a   :  { %2580 = vmatpush1.bf16.msra.mxu0 %v4375_v9  ;;  %2752 = vmatpush1.bf16.msra.mxu1 %v4378_v10  ;;  %v689_v27 = vmax.f32 %v637_v16, 0.0  ;;  %v641_v28 = vadd.f32 %v640_v24, %v208_v8  ;;  %v678_v47 = vadd.f32 %v677_v43, %v212_v40  ;;  %v4071_v48 = vpop.f32.mrb[5].mxu1  ;;  %v4419_v8 = vld [vmem:[#allocation8 + $0x48c] ss:$20 sps:$4 sm:$0xff]   ;;  %v4422_v9 = vld [vmem:[#allocation8 + $0x494] ss:$20 sps:$4 sm:$0xff]  }
 0x19b   :  { %2581 = vmatprep.subr.bf16.mxu0 %v4383_v12  ;;  %2753 = vmatprep.subr.bf16.mxu1 %v4386_v13  ;;  %v695_v31 = vmax.f32 %v639_v23, 0.0  ;;  %v680_v49 = vpop.f32.mrb[6].mxu1  ;;  %v4417_v10 = vld [vmem:[#allocation8 + $0x488] ss:$20 sps:$4 sm:$0xff]   ;;  %v4423_v14 = vld [vmem:[#allocation8 + $0x4b0] ss:$20 sps:$4 sm:$0xff]  }
 0x19c   :  { %v696_v33 = vmax.f32 %v641_v28, 0.0  ;;  %v690_v51 = vmax.f32 %v678_v47, 0.0  ;;  %v681_v52 = vadd.f32 %v680_v49, %v212_v40  ;;  %v4072_v54 = vpop.f32.mrb[7].mxu1  ;;  %v4425_v12 = vld [vmem:[#allocation8 + $0x4b4] ss:$20 sps:$4 sm:$0xff]  }
 0x19d   :  { %v5079_v34 = vpack.c.bf16 %v695_v31, %v688_v19  ;;  %v4428_v13 = vld [vmem:[#allocation8 + $0x4bc] ss:$20 sps:$4 sm:$0xff]   ;;  %v4434_v18 = vld [vmem:[#allocation8 + $0x4e4] ss:$20 sps:$4 sm:$0xff]   ;;  %v4432_v23 = vld [vmem:[#allocation8 + $0x4e0] ss:$20 sps:$4 sm:$0xff]  }
 0x19e   :  { %2582 = vmatpush1.bf16.msra.mxu0 %v4381_v25  ;;  %2754 = vmatpush1.bf16.msra.mxu1 %v4384_v26  ;;  %v5081_v37 = vpack.c.bf16 %v696_v33, %v689_v27  ;;  %v697_v58 = vmax.f32 %v681_v52, 0.0  ;;  %v4431_v16 = vld [vmem:[#allocation8 + $0x4dc] ss:$20 sps:$4 sm:$0xff]   ;;  %v4429_v19 = vld [vmem:[#allocation8 + $0x4d8] ss:$20 sps:$4 sm:$0xff]  }
 0x19f   :  { %2583 = vmatprep.subr.bf16.mxu0 %v4389_v29  ;;  %2755 = vmatprep.subr.bf16.mxu1 %v4392_v30  ;;  %v4437_v24 = vld [vmem:[#allocation8 + $0x504] ss:$20 sps:$4 sm:$0xff]   ;;  %v4440_v25 = vld [vmem:[#allocation8 + $0x50c] ss:$20 sps:$4 sm:$0xff]   ;;  %v4438_v27 = vld [vmem:[#allocation8 + $0x508] ss:$20 sps:$4 sm:$0xff]  }
 0x1a0   :  { %v5084_v59 = vpack.c.bf16 %v697_v58, %v690_v51  ;;  %v4435_v26 = vld [vmem:[#allocation8 + $0x500] ss:$20 sps:$4 sm:$0xff]   ;;  %v4441_v30 = vld [vmem:[#allocation8 + $0x528] ss:$20 sps:$4 sm:$0xff]   ;;  %v4444_v31 = vld [vmem:[#allocation8 + $0x530] ss:$20 sps:$4 sm:$0xff]  }
 0x1a1   :  { %v4443_v28 = vld [vmem:[#allocation8 + $0x52c] ss:$20 sps:$4 sm:$0xff]   ;;  %v4446_v29 = vld [vmem:[#allocation8 + $0x534] ss:$20 sps:$4 sm:$0xff]   ;;  %v4452_v33 = vld [vmem:[#allocation8 + $0x55c] ss:$20 sps:$4 sm:$0xff]  }
 0x1a2   :  { %2584 = vmatpush1.bf16.msra.mxu0 %v4387_v35  ;;  %2756 = vmatpush1.bf16.msra.mxu1 %v4390_v36  ;;  %v4447_v35 = vld [vmem:[#allocation8 + $0x550] ss:$20 sps:$4 sm:$0xff]   ;;  %v4450_v36 = vld [vmem:[#allocation8 + $0x558] ss:$20 sps:$4 sm:$0xff]   ;;  %v4470_v48 = vld [vmem:[#allocation8 + $0x5d4] ss:$20 sps:$4 sm:$0xff]  }
 0x1a3   :  { %2585 = vmatprep.subr.bf16.mxu0 %v4395_v38  ;;  %2757 = vmatprep.subr.bf16.mxu1 %v4398_v39  ;;  %v4455_v38 = vld [vmem:[#allocation8 + $0x57c] ss:$20 sps:$4 sm:$0xff]   ;;  %v4458_v39 = vld [vmem:[#allocation8 + $0x584] ss:$20 sps:$4 sm:$0xff]   ;;  %v4464_v43 = vld [vmem:[#allocation8 + $0x5ac] ss:$20 sps:$4 sm:$0xff]  }
 0x1a4   :  { %v4453_v40 = vld [vmem:[#allocation8 + $0x578] ss:$20 sps:$4 sm:$0xff]   ;;  %v4465_v49 = vld [vmem:[#allocation8 + $0x5c8] ss:$20 sps:$4 sm:$0xff]   ;;  %v4468_v51 = vld [vmem:[#allocation8 + $0x5d0] ss:$20 sps:$4 sm:$0xff]  }
 0x1a5   :  { %v4467_v47 = vld [vmem:[#allocation8 + $0x5cc] ss:$20 sps:$4 sm:$0xff]   ;;  %v4473_v52 = vld [vmem:[#allocation8 + $0x5f4] ss:$20 sps:$4 sm:$0xff]   ;;  %v4476_v54 = vld [vmem:[#allocation8 + $0x5fc] ss:$20 sps:$4 sm:$0xff]  }
 0x1a6   :  { %2586 = vmatpush1.bf16.msra.mxu0 %v4393_v41  ;;  %2758 = vmatpush1.bf16.msra.mxu1 %v4396_v42  ;;  %v4456_v41 = vld [vmem:[#allocation8 + $0x580] ss:$20 sps:$4 sm:$0xff]   ;;  %v4461_v42 = vld [vmem:[#allocation8 + $0x5a4] ss:$20 sps:$4 sm:$0xff]  }
 0x1a7   :  { %2587 = vmatprep.subr.bf16.mxu0 %v4401_v45  ;;  %2759 = vmatprep.subr.bf16.mxu1 %v4404_v46  ;;  %v4459_v45 = vld [vmem:[#allocation8 + $0x5a0] ss:$20 sps:$4 sm:$0xff]   ;;  %v4462_v46 = vld [vmem:[#allocation8 + $0x5a8] ss:$20 sps:$4 sm:$0xff]   ;;  %v4477_v58 = vld [vmem:[#allocation8 + $0x618] ss:$20 sps:$4 sm:$0xff]  }
 0x1aa   :  { %2588 = vmatpush1.bf16.msra.mxu0 %v4399_v55  ;;  %2760 = vmatpush1.bf16.msra.mxu1 %v4402_v56  ;;  %v4471_v55 = vld [vmem:[#allocation8 + $0x5f0] ss:$20 sps:$4 sm:$0xff]   ;;  %v4474_v56 = vld [vmem:[#allocation8 + $0x5f8] ss:$20 sps:$4 sm:$0xff]  }
 0x1ab   :  { %2589 = vmatprep.subr.bf16.mxu0 %v4407_v2  ;;  %2761 = vmatprep.subr.bf16.mxu1 %v4410_v57  ;;  %v4479_v2 = vld [vmem:[#allocation8 + $0x61c] ss:$20 sps:$4 sm:$0xff]   ;;  %v4482_v57 = vld [vmem:[#allocation8 + $0x624] ss:$20 sps:$4 sm:$0xff]  }
 0x1ae   :  { %2590 = vmatpush1.bf16.msra.mxu0 %v4405_v61  ;;  %2762 = vmatpush1.bf16.msra.mxu1 %v4408_v62  ;;  %v4480_v61 = vld [vmem:[#allocation8 + $0x620] ss:$20 sps:$4 sm:$0xff]   ;;  %v4485_v62 = vld [vmem:[#allocation8 + $0x644] ss:$20 sps:$4 sm:$0xff]  }
 0x1af   :  { %2591 = vmatprep.subr.bf16.mxu0 %v4413_v63  ;;  %2763 = vmatprep.subr.bf16.mxu1 %v4416_v5  ;;  %v4488_v63 = vld [vmem:[#allocation8 + $0x64c] ss:$20 sps:$4 sm:$0xff]  }
 0x1b0   :  { %v4483_v5 = vld [vmem:[#allocation8 + $0x640] ss:$20 sps:$4 sm:$0xff]  }
 0x1b2   :  { %2592 = vmatpush1.bf16.msra.mxu0 %v4411_v6  ;;  %2764 = vmatpush1.bf16.msra.mxu1 %v4414_v7  ;;  %v4486_v6 = vld [vmem:[#allocation8 + $0x648] ss:$20 sps:$4 sm:$0xff]   ;;  %v4491_v7 = vld [vmem:[#allocation8 + $0x66c] ss:$20 sps:$4 sm:$0xff]  }
 0x1b3   :  { %2593 = vmatprep.subr.bf16.mxu0 %v4419_v8  ;;  %2765 = vmatprep.subr.bf16.mxu1 %v4422_v9  ;;  %v4494_v8 = vld [vmem:[#allocation8 + $0x674] ss:$20 sps:$4 sm:$0xff]  }
 0x1b4   :  { %v4489_v9 = vld [vmem:[#allocation8 + $0x668] ss:$20 sps:$4 sm:$0xff]  }
 0x1b6   :  { %2594 = vmatpush1.bf16.msra.mxu0 %v4417_v10  ;;  %2766 = vmatpush1.bf16.msra.mxu1 %v4420_v11  ;;  %v4492_v10 = vld [vmem:[#allocation8 + $0x670] ss:$20 sps:$4 sm:$0xff]   ;;  %v4497_v11 = vld [vmem:[#allocation8 + $0x694] ss:$20 sps:$4 sm:$0xff]  }
 0x1b7   :  { %2595 = vmatprep.subr.bf16.mxu0 %v4425_v12  ;;  %2767 = vmatprep.subr.bf16.mxu1 %v4428_v13  ;;  %v4500_v12 = vld [vmem:[#allocation8 + $0x69c] ss:$20 sps:$4 sm:$0xff]  }
 0x1b8   :  { %v4495_v13 = vld [vmem:[#allocation8 + $0x690] ss:$20 sps:$4 sm:$0xff]  }
 0x1ba   :  { %2596 = vmatpush1.bf16.msra.mxu0 %v4423_v14  ;;  %2768 = vmatpush1.bf16.msra.mxu1 %v4426_v15  ;;  %v4498_v14 = vld [vmem:[#allocation8 + $0x698] ss:$20 sps:$4 sm:$0xff]   ;;  %v4503_v15 = vld [vmem:[#allocation8 + $0x6bc] ss:$20 sps:$4 sm:$0xff]  }
 0x1bb   :  { %2597 = vmatprep.subr.bf16.mxu0 %v4431_v16  ;;  %2769 = vmatprep.subr.bf16.mxu1 %v4434_v18  ;;  %v4506_v16 = vld [vmem:[#allocation8 + $0x6c4] ss:$20 sps:$4 sm:$0xff]  }
 0x1bc   :  { %v4501_v18 = vld [vmem:[#allocation8 + $0x6b8] ss:$20 sps:$4 sm:$0xff]  }
 0x1be   :  { %2598 = vmatpush1.bf16.msra.mxu0 %v4429_v19  ;;  %2770 = vmatpush1.bf16.msra.mxu1 %v4432_v23  ;;  %v4504_v19 = vld [vmem:[#allocation8 + $0x6c0] ss:$20 sps:$4 sm:$0xff]   ;;  %v4509_v23 = vld [vmem:[#allocation8 + $0x6e4] ss:$20 sps:$4 sm:$0xff]  }
 0x1bf   :  { %2610 = vmatprep.subr.bf16.mxu0 %v4437_v24  ;;  %2782 = vmatprep.subr.bf16.mxu1 %v4440_v25  ;;  %v4512_v24 = vld [vmem:[#allocation8 + $0x6ec] ss:$20 sps:$4 sm:$0xff]  }
 0x1c0   :  { %v4507_v25 = vld [vmem:[#allocation8 + $0x6e0] ss:$20 sps:$4 sm:$0xff]  }
 0x1c1   :  { %2600 = vmatmul.mubr.bf16.vlgmr.msra.gmra.mrb[8].mxu0 %v5066_v50  ;;  %2772 = vmatmul.mubr.bf16.vlgmr.msra.gmra.mrb[8].mxu1 %v5066_v50 }
 0x1c2   :  { %2611 = vmatpush1.bf16.msra.mxu0 %v4435_v26  ;;  %2783 = vmatpush1.bf16.msra.mxu1 %v4438_v27  ;;  %v4510_v26 = vld [vmem:[#allocation8 + $0x6e8] ss:$20 sps:$4 sm:$0xff]   ;;  %v4515_v27 = vld [vmem:[#allocation8 + $0x70c] ss:$20 sps:$4 sm:$0xff]  }
 0x1c3   :  { %2612 = vmatprep.subr.bf16.mxu0 %v4443_v28  ;;  %2784 = vmatprep.subr.bf16.mxu1 %v4446_v29  ;;  %v4518_v28 = vld [vmem:[#allocation8 + $0x714] ss:$20 sps:$4 sm:$0xff]  }
 0x1c4   :  { %2642 = vmatprep.mubr.bf16.mxu0 %v5081_v37  ;;  %2814 = vmatprep.mubr.bf16.mxu1 %v5081_v37  ;;  %v4513_v29 = vld [vmem:[#allocation8 + $0x708] ss:$20 sps:$4 sm:$0xff]  }
 0x1c6   :  { %2613 = vmatpush1.bf16.msra.mxu0 %v4441_v30  ;;  %2785 = vmatpush1.bf16.msra.mxu1 %v4444_v31  ;;  %v4516_v30 = vld [vmem:[#allocation8 + $0x710] ss:$20 sps:$4 sm:$0xff]   ;;  %v4521_v31 = vld [vmem:[#allocation8 + $0x734] ss:$20 sps:$4 sm:$0xff]  }
 0x1c7   :  { %2614 = vmatprep.subr.bf16.mxu0 %v4449_v32  ;;  %2786 = vmatprep.subr.bf16.mxu1 %v4452_v33  ;;  %v4524_v32 = vld [vmem:[#allocation8 + $0x73c] ss:$20 sps:$4 sm:$0xff]  }
 0x1c8   :  { %v4519_v33 = vld [vmem:[#allocation8 + $0x730] ss:$20 sps:$4 sm:$0xff]  }
 0x1ca   :  { %2615 = vmatpush1.bf16.msra.mxu0 %v4447_v35  ;;  %2787 = vmatpush1.bf16.msra.mxu1 %v4450_v36  ;;  %v4522_v35 = vld [vmem:[#allocation8 + $0x738] ss:$20 sps:$4 sm:$0xff]   ;;  %v4527_v36 = vld [vmem:[#allocation8 + $0x75c] ss:$20 sps:$4 sm:$0xff]  }
 0x1cb   :  { %2616 = vmatprep.subr.bf16.mxu0 %v4455_v38  ;;  %2788 = vmatprep.subr.bf16.mxu1 %v4458_v39  ;;  %v4530_v38 = vld [vmem:[#allocation8 + $0x764] ss:$20 sps:$4 sm:$0xff]  }
 0x1cc   :  { %v4525_v39 = vld [vmem:[#allocation8 + $0x758] ss:$20 sps:$4 sm:$0xff]  }
 0x1ce   :  { %2617 = vmatpush1.bf16.msra.mxu0 %v4453_v40  ;;  %2789 = vmatpush1.bf16.msra.mxu1 %v4456_v41  ;;  %v4528_v40 = vld [vmem:[#allocation8 + $0x760] ss:$20 sps:$4 sm:$0xff]   ;;  %v4533_v41 = vld [vmem:[#allocation8 + $0x784] ss:$20 sps:$4 sm:$0xff]  }
 0x1cf   :  { %2618 = vmatprep.subr.bf16.mxu0 %v4461_v42  ;;  %2790 = vmatprep.subr.bf16.mxu1 %v4464_v43  ;;  %v4536_v42 = vld [vmem:[#allocation8 + $0x78c] ss:$20 sps:$4 sm:$0xff]  }
 0x1d0   :  { %v4531_v43 = vld [vmem:[#allocation8 + $0x780] ss:$20 sps:$4 sm:$0xff]  }
 0x1d2   :  { %2619 = vmatpush1.bf16.msra.mxu0 %v4459_v45  ;;  %2791 = vmatpush1.bf16.msra.mxu1 %v4462_v46  ;;  %v4534_v45 = vld [vmem:[#allocation8 + $0x788] ss:$20 sps:$4 sm:$0xff]   ;;  %v4539_v46 = vld [vmem:[#allocation8 + $0x7ac] ss:$20 sps:$4 sm:$0xff]  }
 0x1d3   :  { %2620 = vmatprep.subr.bf16.mxu0 %v4467_v47  ;;  %2792 = vmatprep.subr.bf16.mxu1 %v4470_v48  ;;  %v4542_v47 = vld [vmem:[#allocation8 + $0x7b4] ss:$20 sps:$4 sm:$0xff]  }
 0x1d4   :  { %v4537_v48 = vld [vmem:[#allocation8 + $0x7a8] ss:$20 sps:$4 sm:$0xff]  }
 0x1d6   :  { %2621 = vmatpush1.bf16.msra.mxu0 %v4465_v49  ;;  %2793 = vmatpush1.bf16.msra.mxu1 %v4468_v51  ;;  %v4540_v49 = vld [vmem:[#allocation8 + $0x7b0] ss:$20 sps:$4 sm:$0xff]   ;;  %v4545_v51 = vld [vmem:[#allocation8 + $0x7d4] ss:$20 sps:$4 sm:$0xff]  }
 0x1d7   :  { %2622 = vmatprep.subr.bf16.mxu0 %v4473_v52  ;;  %2794 = vmatprep.subr.bf16.mxu1 %v4476_v54  ;;  %v4548_v52 = vld [vmem:[#allocation8 + $0x7dc] ss:$20 sps:$4 sm:$0xff]  }
 0x1d8   :  { %v4543_v54 = vld [vmem:[#allocation8 + $0x7d0] ss:$20 sps:$4 sm:$0xff]  }
 0x1da   :  { %2623 = vmatpush1.bf16.msra.mxu0 %v4471_v55  ;;  %2795 = vmatpush1.bf16.msra.mxu1 %v4474_v56  ;;  %v4546_v55 = vld [vmem:[#allocation8 + $0x7d8] ss:$20 sps:$4 sm:$0xff]   ;;  %v4551_v56 = vld [vmem:[#allocation8 + $0x7fc] ss:$20 sps:$4 sm:$0xff]  }
 0x1db   :  { %2624 = vmatprep.subr.bf16.mxu0 %v4479_v2  ;;  %2796 = vmatprep.subr.bf16.mxu1 %v4482_v57  ;;  %v4554_v2 = vld [vmem:[#allocation8 + $0x804] ss:$20 sps:$4 sm:$0xff]  }
 0x1dc   :  { %v4549_v57 = vld [vmem:[#allocation8 + $0x7f8] ss:$20 sps:$4 sm:$0xff]  }
 0x1de   :  { %2625 = vmatpush1.bf16.msra.mxu0 %v4477_v58  ;;  %2797 = vmatpush1.bf16.msra.mxu1 %v4480_v61  ;;  %v4552_v58 = vld [vmem:[#allocation8 + $0x800] ss:$20 sps:$4 sm:$0xff]   ;;  %v4557_v61 = vld [vmem:[#allocation8 + $0x824] ss:$20 sps:$4 sm:$0xff]  }
 0x1df   :  { %2626 = vmatprep.subr.bf16.mxu0 %v4485_v62  ;;  %2798 = vmatprep.subr.bf16.mxu1 %v4488_v63  ;;  %v4560_v62 = vld [vmem:[#allocation8 + $0x82c] ss:$20 sps:$4 sm:$0xff]  }
 0x1e0   :  { %v4555_v63 = vld [vmem:[#allocation8 + $0x820] ss:$20 sps:$4 sm:$0xff]  }
 0x1e2   :  { %2627 = vmatpush1.bf16.msra.mxu0 %v4483_v5  ;;  %2799 = vmatpush1.bf16.msra.mxu1 %v4486_v6  ;;  %v4563_v5 = vld [vmem:[#allocation8 + $0x84c] ss:$20 sps:$4 sm:$0xff]   ;;  %v4566_v6 = vld [vmem:[#allocation8 + $0x854] ss:$20 sps:$4 sm:$0xff]  }
 0x1e3   :  { %2628 = vmatprep.subr.bf16.mxu0 %v4491_v7  ;;  %2800 = vmatprep.subr.bf16.mxu1 %v4494_v8  ;;  %v4561_v7 = vld [vmem:[#allocation8 + $0x848] ss:$20 sps:$4 sm:$0xff]   ;;  %v4564_v8 = vld [vmem:[#allocation8 + $0x850] ss:$20 sps:$4 sm:$0xff]  }
 0x1e6   :  { %2629 = vmatpush1.bf16.msra.mxu0 %v4489_v9  ;;  %2801 = vmatpush1.bf16.msra.mxu1 %v4492_v10  ;;  %v4569_v9 = vld [vmem:[#allocation8 + $0x874] ss:$20 sps:$4 sm:$0xff]   ;;  %v4572_v10 = vld [vmem:[#allocation8 + $0x87c] ss:$20 sps:$4 sm:$0xff]  }
 0x1e7   :  { %2630 = vmatprep.subr.bf16.mxu0 %v4497_v11  ;;  %2802 = vmatprep.subr.bf16.mxu1 %v4500_v12  ;;  %v4567_v11 = vld [vmem:[#allocation8 + $0x870] ss:$20 sps:$4 sm:$0xff]   ;;  %v4570_v12 = vld [vmem:[#allocation8 + $0x878] ss:$20 sps:$4 sm:$0xff]  }
 0x1ea   :  { %2631 = vmatpush1.bf16.msra.mxu0 %v4495_v13  ;;  %2803 = vmatpush1.bf16.msra.mxu1 %v4498_v14  ;;  %v4575_v13 = vld [vmem:[#allocation8 + $0x89c] ss:$20 sps:$4 sm:$0xff]   ;;  %v4578_v14 = vld [vmem:[#allocation8 + $0x8a4] ss:$20 sps:$4 sm:$0xff]  }
 0x1eb   :  { %2632 = vmatprep.subr.bf16.mxu0 %v4503_v15  ;;  %2804 = vmatprep.subr.bf16.mxu1 %v4506_v16  ;;  %v4573_v15 = vld [vmem:[#allocation8 + $0x898] ss:$20 sps:$4 sm:$0xff]   ;;  %v4576_v16 = vld [vmem:[#allocation8 + $0x8a0] ss:$20 sps:$4 sm:$0xff]  }
 0x1ee   :  { %2633 = vmatpush1.bf16.msra.mxu0 %v4501_v18  ;;  %2805 = vmatpush1.bf16.msra.mxu1 %v4504_v19  ;;  %v4579_v18 = vld [vmem:[#allocation8 + $0x150] ss:$20 sps:$4 sm:$0xff]  }
 0x1ef   :  { %2634 = vmatprep.subr.bf16.mxu0 %v4509_v23  ;;  %2806 = vmatprep.subr.bf16.mxu1 %v4512_v24  ;;  %v4580_v19 = vld [vmem:[#allocation8 + $0x3d0] ss:$20 sps:$4 sm:$0xff]  }
 0x1f0   :  { %v4581_v23 = vld [vmem:[#allocation8 + $0x10] ss:$20 sps:$4 sm:$0xff]  }
 0x1f1   :  { %v4582_v24 = vld [vmem:[#allocation8 + $0x290] ss:$20 sps:$4 sm:$0xff]  }
 0x1f2   :  { %2635 = vmatpush1.bf16.msra.mxu0 %v4507_v25  ;;  %2807 = vmatpush1.bf16.msra.mxu1 %v4510_v26  ;;  %v4583_v25 = vld [vmem:[#allocation8 + $0x178] ss:$20 sps:$4 sm:$0xff]  }
 0x1f3   :  { %2636 = vmatprep.subr.bf16.mxu0 %v4515_v27  ;;  %2808 = vmatprep.subr.bf16.mxu1 %v4518_v28  ;;  %v4584_v26 = vld [vmem:[#allocation8 + $0x3f8] ss:$20 sps:$4 sm:$0xff]  }
 0x1f4   :  { %v4585_v27 = vld [vmem:[#allocation8 + $0x38] ss:$20 sps:$4 sm:$0xff]  }
 0x1f5   :  { %v4586_v28 = vld [vmem:[#allocation8 + $0x2b8] ss:$20 sps:$4 sm:$0xff]  }
 0x1f6   :  { %2637 = vmatpush1.bf16.msra.mxu0 %v4513_v29  ;;  %2809 = vmatpush1.bf16.msra.mxu1 %v4516_v30  ;;  %v4587_v29 = vld [vmem:[#allocation8 + $0x1a0] ss:$20 sps:$4 sm:$0xff]  }
 0x1f7   :  { %2638 = vmatprep.subr.bf16.mxu0 %v4521_v31  ;;  %2810 = vmatprep.subr.bf16.mxu1 %v4524_v32  ;;  %v4588_v30 = vld [vmem:[#allocation8 + $0x420] ss:$20 sps:$4 sm:$0xff]  }
 0x1f8   :  { %v4589_v31 = vld [vmem:[#allocation8 + $0x60] ss:$20 sps:$4 sm:$0xff]  }
 0x1f9   :  { %v4590_v32 = vld [vmem:[#allocation8 + $0x2e0] ss:$20 sps:$4 sm:$0xff]  }
 0x1fa   :  { %2639 = vmatpush1.bf16.msra.mxu0 %v4519_v33  ;;  %2811 = vmatpush1.bf16.msra.mxu1 %v4522_v35  ;;  %v4591_v33 = vld [vmem:[#allocation8 + $0x1c8] ss:$20 sps:$4 sm:$0xff]  }
 0x1fb   :  { %2640 = vmatprep.subr.bf16.mxu0 %v4527_v36  ;;  %2812 = vmatprep.subr.bf16.mxu1 %v4530_v38  ;;  %v4592_v35 = vld [vmem:[#allocation8 + $0x448] ss:$20 sps:$4 sm:$0xff]   ;;  %v4595_v38 = vld [vmem:[#allocation8 + $0x1f0] ss:$20 sps:$4 sm:$0xff]  }
 0x1fc   :  { %v4593_v36 = vld [vmem:[#allocation8 + $0x88] ss:$20 sps:$4 sm:$0xff]  }
 0x1fe   :  { %2641 = vmatpush1.bf16.msra.mxu0 %v4525_v39  ;;  %2813 = vmatpush1.bf16.msra.mxu1 %v4528_v40  ;;  %v4597_v39 = vld [vmem:[#allocation8 + $0xb0] ss:$20 sps:$4 sm:$0xff]  }
 0x1ff   :  { %2653 = vmatprep.subr.bf16.mxu0 %v4533_v41  ;;  %2825 = vmatprep.subr.bf16.mxu1 %v4536_v42  ;;  %v4598_v40 = vld [vmem:[#allocation8 + $0x330] ss:$20 sps:$4 sm:$0xff]   ;;  %v4599_v41 = vld [vmem:[#allocation8 + $0x218] ss:$20 sps:$4 sm:$0xff]  }
 0x200   :  { %v4600_v42 = vld [vmem:[#allocation8 + $0x498] ss:$20 sps:$4 sm:$0xff]  }
 0x201   :  { %2643 = vmatmul.mubr.bf16.vlgmr.msra.gmra.mrb[8].mxu0 %v5079_v34  ;;  %2815 = vmatmul.mubr.bf16.vlgmr.msra.gmra.mrb[8].mxu1 %v5079_v34 }
 0x202   :  { %2654 = vmatpush1.bf16.msra.mxu0 %v4531_v43  ;;  %2826 = vmatpush1.bf16.msra.mxu1 %v4534_v45  ;;  %v4601_v43 = vld [vmem:[#allocation8 + $0xd8] ss:$20 sps:$4 sm:$0xff]  }
 0x203   :  { %2655 = vmatprep.subr.bf16.mxu0 %v4539_v46  ;;  %2827 = vmatprep.subr.bf16.mxu1 %v4542_v47  ;;  %v4602_v45 = vld [vmem:[#allocation8 + $0x358] ss:$20 sps:$4 sm:$0xff]   ;;  %v4603_v46 = vld [vmem:[#allocation8 + $0x240] ss:$20 sps:$4 sm:$0xff]  }
 0x204   :  { %2685 = vmatprep.mubr.bf16.mxu0 %v4878_v0  ;;  %2857 = vmatprep.mubr.bf16.mxu1 %v4878_v0  ;;  %v4558_v0 = vld [vmem:[#allocation8 + $0x828] ss:$20 sps:$4 sm:$0xff]   ;;  %v4604_v47 = vld [vmem:[#allocation8 + $0x4c0] ss:$20 sps:$4 sm:$0xff]  }
 0x206   :  { %2656 = vmatpush1.bf16.msra.mxu0 %v4537_v48  ;;  %2828 = vmatpush1.bf16.msra.mxu1 %v4540_v49  ;;  %v4605_v48 = vld [vmem:[#allocation8 + $0x100] ss:$20 sps:$4 sm:$0xff]  }
 0x207   :  { %2657 = vmatprep.subr.bf16.mxu0 %v4545_v51  ;;  %2829 = vmatprep.subr.bf16.mxu1 %v4548_v52  ;;  %v4606_v49 = vld [vmem:[#allocation8 + $0x380] ss:$20 sps:$4 sm:$0xff]   ;;  %v4607_v51 = vld [vmem:[#allocation8 + $0x268] ss:$20 sps:$4 sm:$0xff]  }
 0x208   :  { %v4608_v52 = vld [vmem:[#allocation8 + $0x4e8] ss:$20 sps:$4 sm:$0xff]  }
 0x20a   :  { %2658 = vmatpush1.bf16.msra.mxu0 %v4543_v54  ;;  %2830 = vmatpush1.bf16.msra.mxu1 %v4546_v55  ;;  %v4609_v54 = vld [vmem:[#allocation8 + $0x128] ss:$20 sps:$4 sm:$0xff]  }
 0x20b   :  { %2659 = vmatprep.subr.bf16.mxu0 %v4551_v56  ;;  %2831 = vmatprep.subr.bf16.mxu1 %v4554_v2  ;;  %v4610_v55 = vld [vmem:[#allocation8 + $0x3a8] ss:$20 sps:$4 sm:$0xff]   ;;  %v4611_v56 = vld [vmem:[#allocation8 + $0x650] ss:$20 sps:$4 sm:$0xff]  }
 0x20c   :  { %v4612_v2 = vld [vmem:[#allocation8 + $0x510] ss:$20 sps:$4 sm:$0xff]  }
 0x20e   :  { %2660 = vmatpush1.bf16.msra.mxu0 %v4549_v57  ;;  %2832 = vmatpush1.bf16.msra.mxu1 %v4552_v58  ;;  %v4613_v57 = vld [vmem:[#allocation8 + $0x790] ss:$20 sps:$4 sm:$0xff]   ;;  %v4614_v58 = vld [vmem:[#allocation8 + $0x678] ss:$20 sps:$4 sm:$0xff]  }
 0x20f   :  { %2661 = vmatprep.subr.bf16.mxu0 %v4557_v61  ;;  %2833 = vmatprep.subr.bf16.mxu1 %v4560_v62  ;;  %v4615_v61 = vld [vmem:[#allocation8 + $0x538] ss:$20 sps:$4 sm:$0xff]  }
 0x210   :  { %v4616_v62 = vld [vmem:[#allocation8 + $0x7b8] ss:$20 sps:$4 sm:$0xff]  }
 0x212   :  { %2662 = vmatpush1.bf16.msra.mxu0 %v4555_v63  ;;  %2834 = vmatpush1.bf16.msra.mxu1 %v4558_v0  ;;  %v4617_v63 = vld [vmem:[#allocation8 + $0x6a0] ss:$20 sps:$4 sm:$0xff]  }
 0x213   :  { %2663 = vmatprep.subr.bf16.mxu0 %v4563_v5  ;;  %2835 = vmatprep.subr.bf16.mxu1 %v4566_v6  ;;  %v4618_v0 = vld [vmem:[#allocation8 + $0x560] ss:$20 sps:$4 sm:$0xff]   ;;  %v4620_v5 = vld [vmem:[#allocation8 + $0x6c8] ss:$20 sps:$4 sm:$0xff]   ;;  %v4623_v6 = vld [vmem:[#allocation8 + $0x6f0] ss:$20 sps:$4 sm:$0xff]  }
 0x216   :  { %2664 = vmatpush1.bf16.msra.mxu0 %v4561_v7  ;;  %2836 = vmatpush1.bf16.msra.mxu1 %v4564_v8  ;;  %v4624_v7 = vld [vmem:[#allocation8 + $0x5b0] ss:$20 sps:$4 sm:$0xff]  }
 0x217   :  { %2665 = vmatprep.subr.bf16.mxu0 %v4569_v9  ;;  %2837 = vmatprep.subr.bf16.mxu1 %v4572_v10  ;;  %v4625_v8 = vld [vmem:[#allocation8 + $0x830] ss:$20 sps:$4 sm:$0xff]   ;;  %v4626_v9 = vld [vmem:[#allocation8 + $0x718] ss:$20 sps:$4 sm:$0xff]  }
 0x218   :  { %v4627_v10 = vld [vmem:[#allocation8 + $0x5d8] ss:$20 sps:$4 sm:$0xff]  }
 0x21a   :  { %2666 = vmatpush1.bf16.msra.mxu0 %v4567_v11  ;;  %2838 = vmatpush1.bf16.msra.mxu1 %v4570_v12  ;;  %v4628_v11 = vld [vmem:[#allocation8 + $0x858] ss:$20 sps:$4 sm:$0xff]   ;;  %v4629_v12 = vld [vmem:[#allocation8 + $0x740] ss:$20 sps:$4 sm:$0xff]  }
 0x21b   :  { %2667 = vmatprep.subr.bf16.mxu0 %v4575_v13  ;;  %2839 = vmatprep.subr.bf16.mxu1 %v4578_v14  ;;  %v4630_v13 = vld [vmem:[#allocation8 + $0x600] ss:$20 sps:$4 sm:$0xff]  }
 0x21c   :  { %v4631_v14 = vld [vmem:[#allocation8 + $0x880] ss:$20 sps:$4 sm:$0xff]  }
 0x21e   :  { %2668 = vmatpush1.bf16.msra.mxu0 %v4573_v15  ;;  %2840 = vmatpush1.bf16.msra.mxu1 %v4576_v16  ;;  %v4632_v15 = vld [vmem:[#allocation8 + $0x768] ss:$20 sps:$4 sm:$0xff]  }
 0x21f   :  { %3925 = vmatprep.subr.bf16.mxu0 %v4579_v18  ;;  %3947 = vmatprep.subr.bf16.mxu1 %v4580_v19  ;;  %v4633_v16 = vld [vmem:[#allocation8 + $0x628] ss:$20 sps:$4 sm:$0xff]  }
 0x220   :  { %v4634_v18 = vld [vmem:[#allocation8 + $0x8a8] ss:$20 sps:$4 sm:$0xff]  }
 0x221   :  { %2686 = vmatmul.mubr.bf16.vlgmr.msra.gmra.mrb[8].mxu0 %v5084_v59  ;;  %2858 = vmatmul.mubr.bf16.vlgmr.msra.gmra.mrb[8].mxu1 %v5084_v59  ;;  %v4635_v19 = vld [vmem:[#allocation11 + $0x40] sm:$0xff]  }
 0x222   :  { %3926 = vmatpush3.bf16.msra.mxu0 %v4581_v23  ;;  %2900 = vmatprep.mubr.bf16.mxu0 %v5054_v22  ;;  %v4594_v22 = vld [vmem:[#allocation8 + $0x308] ss:$20 sps:$4 sm:$0xff]  }
 0x223   :  { %3948 = vmatpush3.bf16.msra.mxu1 %v4582_v24  ;;  %2941 = vmatprep.mubr.bf16.mxu1 %v5068_v53  ;;  %v4596_v53 = vld [vmem:[#allocation8 + $0x470] ss:$20 sps:$4 sm:$0xff]  }
 0x224   :  { %3927 = vmatprep.subr.bf16.mxu0 %v4583_v25  ;;  %3949 = vmatprep.subr.bf16.mxu1 %v4584_v26  ;;  %v4636_v23 = vld [vmem:[#allocation11 + $0xc0] sm:$0xff]   ;;  %v4639_v26 = vld [vmem:[#allocation11 + $0x48] sm:$0xff]  }
 0x225   :  { %v4637_v24 = vld [vmem:[#allocation11] sm:$0xff]  }
 0x226   :  { %3928 = vmatpush3.bf16.msra.mxu0 %v4585_v27  ;;  %v4638_v25 = vld [vmem:[#allocation11 + $0x80] sm:$0xff]   ;;  %v4640_v27 = vld [vmem:[#allocation11 + $0xc8] sm:$0xff]  }
 0x227   :  { %3950 = vmatpush3.bf16.msra.mxu1 %v4586_v28  ;;  %3929 = vmatprep.subr.bf16.mxu0 %v4587_v29  ;;  %v4641_v28 = vld [vmem:[#allocation11 + $0x8] sm:$0xff]  }
 0x228   :  { %3951 = vmatprep.subr.bf16.mxu1 %v4588_v30  ;;  %v4642_v29 = vld [vmem:[#allocation11 + $0x88] sm:$0xff]   ;;  %v4643_v30 = vld [vmem:[#allocation11 + $0x50] sm:$0xff]  }
 0x22a   :  { %3930 = vmatpush3.bf16.msra.mxu0 %v4589_v31  ;;  %v4644_v31 = vld [vmem:[#allocation11 + $0xd0] sm:$0xff]  }
 0x22b   :  { %3952 = vmatpush3.bf16.msra.mxu1 %v4590_v32  ;;  %3931 = vmatprep.subr.bf16.mxu0 %v4591_v33  ;;  %v4645_v32 = vld [vmem:[#allocation11 + $0x10] sm:$0xff]  }
 0x22c   :  { %3953 = vmatprep.subr.bf16.mxu1 %v4592_v35  ;;  %v4646_v33 = vld [vmem:[#allocation11 + $0x90] sm:$0xff]   ;;  %v4647_v35 = vld [vmem:[#allocation11 + $0x58] sm:$0xff]  }
 0x22e   :  { %3932 = vmatpush3.bf16.msra.mxu0 %v4593_v36  ;;  %v4648_v36 = vld [vmem:[#allocation11 + $0xd8] sm:$0xff]  }
 0x22f   :  { %3954 = vmatpush3.bf16.msra.mxu1 %v4594_v22  ;;  %3933 = vmatprep.subr.bf16.mxu0 %v4595_v38  ;;  %v4651_v22 = vld [vmem:[#allocation11 + $0x60] sm:$0xff]  }
 0x230   :  { %3955 = vmatprep.subr.bf16.mxu1 %v4596_v53  ;;  %v4652_v38 = vld [vmem:[#allocation11 + $0xe0] sm:$0xff]  }
 0x231   :  { %v4653_v53 = vld [vmem:[#allocation11 + $0x20] sm:$0xff]  }
 0x232   :  { %3934 = vmatpush3.bf16.msra.mxu0 %v4597_v39  ;;  %v4654_v39 = vld [vmem:[#allocation11 + $0xa0] sm:$0xff]  }
 0x233   :  { %3956 = vmatpush3.bf16.msra.mxu1 %v4598_v40  ;;  %3935 = vmatprep.subr.bf16.mxu0 %v4599_v41  ;;  %v4655_v40 = vld [vmem:[#allocation11 + $0x68] sm:$0xff]  }
 0x234   :  { %3957 = vmatprep.subr.bf16.mxu1 %v4600_v42  ;;  %v4656_v41 = vld [vmem:[#allocation11 + $0xe8] sm:$0xff]  }
 0x235   :  { %v4657_v42 = vld [vmem:[#allocation11 + $0x28] sm:$0xff]  }
 0x236   :  { %3936 = vmatpush3.bf16.msra.mxu0 %v4601_v43  ;;  %v4658_v43 = vld [vmem:[#allocation11 + $0xa8] sm:$0xff]  }
 0x237   :  { %3958 = vmatpush3.bf16.msra.mxu1 %v4602_v45  ;;  %3937 = vmatprep.subr.bf16.mxu0 %v4603_v46  ;;  %v4659_v45 = vld [vmem:[#allocation11 + $0x70] sm:$0xff]  }
 0x238   :  { %3959 = vmatprep.subr.bf16.mxu1 %v4604_v47  ;;  %v4660_v46 = vld [vmem:[#allocation11 + $0xf0] sm:$0xff]  }
 0x239   :  { %v4661_v47 = vld [vmem:[#allocation11 + $0x30] sm:$0xff]  }
 0x23a   :  { %3938 = vmatpush3.bf16.msra.mxu0 %v4605_v48  ;;  %v4662_v48 = vld [vmem:[#allocation11 + $0xb0] sm:$0xff]  }
 0x23b   :  { %3960 = vmatpush3.bf16.msra.mxu1 %v4606_v49  ;;  %3939 = vmatprep.subr.bf16.mxu0 %v4607_v51  ;;  %v4663_v49 = vld [vmem:[#allocation11 + $0x78] sm:$0xff]  }
 0x23c   :  { %3961 = vmatprep.subr.bf16.mxu1 %v4608_v52  ;;  %v4664_v51 = vld [vmem:[#allocation11 + $0xf8] sm:$0xff]  }
 0x23d   :  { %v4665_v52 = vld [vmem:[#allocation11 + $0x38] sm:$0xff]  }
 0x23e   :  { %3940 = vmatpush3.bf16.msra.mxu0 %v4609_v54  ;;  %v4666_v54 = vld [vmem:[#allocation11 + $0xb8] sm:$0xff]  }
 0x23f   :  { %3962 = vmatpush3.bf16.msra.mxu1 %v4610_v55  ;;  %3969 = vmatprep.subr.bf16.mxu0 %v4611_v56  ;;  %v1041_v55 = vld [vmem:[#allocation10] sm:$0x1f] }
 0x240   :  { %4073 = vmatprep.subr.bf16.mxu1 %v4879_v44  ;;  %v1046_v56 = vrot.slane %v1041_v55, %v187_v3 }
 0x241   :  { %2901 = vmatmul.mubr.bf16.vlgmr.msra.gmra.mrb[12].mxu0 %v5052_v21  ;;  %v4619_v21 = vld [vmem:[#allocation8 + $0x7e0] ss:$20 sps:$4 sm:$0xff]  }
 0x242   :  { %2942 = vmatmul.mubr.bf16.vlgmr.msra.gmra.mrb[12].mxu1 %v5066_v50  ;;  %3970 = vmatpush3.bf16.msra.mxu0 %v4612_v2  ;;  %v4621_v50 = vld [vmem:[#allocation8 + $0x588] ss:$20 sps:$4 sm:$0xff]   ;;  %v1054_v2 = vrot.slane %v1041_v55, %v195_v17 }
 0x243   :  { %2982 = vmatprep.mubr.bf16.mxu0 %v5081_v37  ;;  %4074 = vmatpush3.bf16.msra.mxu1 %v4613_v57  ;;  %v4622_v37 = vld [vmem:[#allocation8 + $0x808] ss:$20 sps:$4 sm:$0xff]   ;;  %v1050_v57 = vrot.slane %v1041_v55, %v191_v4 }
 0x244   :  { %3971 = vmatprep.subr.bf16.mxu0 %v4614_v58  ;;  %4075 = vmatprep.subr.bf16.mxu1 %v4879_v44  ;;  %v1058_v58 = vrot.slane %v1041_v55, %v199_v20 }
 0x245   :  { %4089 = vmatprep.mubr.msk.bf16.mxu1 %vm4880_vm0, %v4879_v44 }
 0x246   :  { %3972 = vmatpush3.bf16.msra.mxu0 %v4615_v61 }
 0x247   :  { %4076 = vmatpush3.bf16.msra.mxu1 %v4616_v62  ;;  %3973 = vmatprep.subr.bf16.mxu0 %v4617_v63 }
 0x248   :  { %4077 = vmatprep.subr.bf16.mxu1 %v4879_v44 }
 0x24a   :  { %3974 = vmatpush3.bf16.msra.mxu0 %v4618_v0 }
 0x24b   :  { %4078 = vmatpush3.bf16.msra.mxu1 %v4619_v21  ;;  %3975 = vmatprep.subr.bf16.mxu0 %v4620_v5 }
 0x24c   :  { %4079 = vmatprep.subr.bf16.mxu1 %v4879_v44 }
 0x24e   :  { %3976 = vmatpush3.bf16.msra.mxu0 %v4621_v50 }
 0x24f   :  { %4080 = vmatpush3.bf16.msra.mxu1 %v4622_v37  ;;  %3977 = vmatprep.subr.bf16.mxu0 %v4623_v6 }
 0x250   :  { %4081 = vmatprep.subr.bf16.mxu1 %v4879_v44 }
 0x252   :  { %3978 = vmatpush3.bf16.msra.mxu0 %v4624_v7 }
 0x253   :  { %4082 = vmatpush3.bf16.msra.mxu1 %v4625_v8  ;;  %3979 = vmatprep.subr.bf16.mxu0 %v4626_v9 }
 0x254   :  { %4083 = vmatprep.subr.bf16.mxu1 %v4879_v44 }
 0x256   :  { %3980 = vmatpush3.bf16.msra.mxu0 %v4627_v10 }
 0x257   :  { %4084 = vmatpush3.bf16.msra.mxu1 %v4628_v11  ;;  %3981 = vmatprep.subr.bf16.mxu0 %v4629_v12 }
 0x258   :  { %4085 = vmatprep.subr.bf16.mxu1 %v4879_v44 }
 0x25a   :  { %3982 = vmatpush3.bf16.msra.mxu0 %v4630_v13 }
 0x25b   :  { %4086 = vmatpush3.bf16.msra.mxu1 %v4631_v14  ;;  %3983 = vmatprep.subr.bf16.mxu0 %v4632_v15 }
 0x25c   :  { %4087 = vmatprep.subr.bf16.mxu1 %v4879_v44 }
 0x25e   :  { %3984 = vmatpush3.bf16.msra.mxu0 %v4633_v16 }
 0x25f   :  { %4088 = vmatpush3.bf16.msra.mxu1 %v4634_v18  ;;  %4000 = vmatprep.subr.bf16.mxu0 %v4635_v19 }
 0x260   :  { %4022 = vmatprep.subr.bf16.mxu1 %v4636_v23 }
 0x261   :  { %2983 = vmatmul.mubr.bf16.vlgmr.msra.gmra.mrb[16].mxu0 %v5079_v34  ;;  %v4649_v34 = vld [vmem:[#allocation11 + $0x18] sm:$0xff]  }
 0x262   :  { %4090 = vmatmul.mubr.bf16.vlgmr.msra.gmra.mrb[16].mxu1 %v5084_v59  ;;  %4001 = vmatpush3.bf16.msra.mxu0 %v4637_v24  ;;  %v4650_v59 = vld [vmem:[#allocation11 + $0x98] sm:$0xff]  }
 0x263   :  { %4023 = vmatpush3.bf16.msra.mxu1 %v4638_v25  ;;  %4002 = vmatprep.subr.bf16.mxu0 %v4639_v26  ;;  %v4667_v26 = vld [vmem:[#allocation11 + $0x100] sm:$0xff]  }
 0x264   :  { %4024 = vmatprep.subr.bf16.mxu1 %v4640_v27  ;;  %v4668_v27 = vld [vmem:[#allocation11 + $0x108] sm:$0xff]  }
 0x266   :  { %4003 = vmatpush3.bf16.msra.mxu0 %v4641_v28  ;;  %v4669_v28 = vld [vmem:[#allocation11 + $0x110] sm:$0xff]  }
 0x267   :  { %4025 = vmatpush3.bf16.msra.mxu1 %v4642_v29  ;;  %4004 = vmatprep.subr.bf16.mxu0 %v4643_v30  ;;  %v4670_v29 = vld [vmem:[#allocation11 + $0x118] sm:$0xff]   ;;  %v4671_v30 = vld [vmem:[#allocation11 + $0x120] sm:$0xff]  }
 0x268   :  { %4026 = vmatprep.subr.bf16.mxu1 %v4644_v31  ;;  %v4672_v31 = vld [vmem:[#allocation11 + $0x128] sm:$0xff]  }
 0x26a   :  { %4005 = vmatpush3.bf16.msra.mxu0 %v4645_v32 }
 0x26b   :  { %4027 = vmatpush3.bf16.msra.mxu1 %v4646_v33  ;;  %4006 = vmatprep.subr.bf16.mxu0 %v4647_v35  ;;  %v1062_v33 = vrot.slane %v1041_v55, %v203_v60  ;;  %v4673_v35 = vld [vmem:[#allocation11 + $0x130] sm:$0xff]  }
 0x26c   :  { %4028 = vmatprep.subr.bf16.mxu1 %v4648_v36 }
 0x26e   :  { %4007 = vmatpush3.bf16.msra.mxu0 %v4649_v34 }
 0x26f   :  { %4029 = vmatpush3.bf16.msra.mxu1 %v4650_v59  ;;  %4008 = vmatprep.subr.bf16.mxu0 %v4651_v22 }
 0x270   :  { %4030 = vmatprep.subr.bf16.mxu1 %v4652_v38 }
 0x272   :  { %4009 = vmatpush3.bf16.msra.mxu0 %v4653_v53 }
 0x273   :  { %4031 = vmatpush3.bf16.msra.mxu1 %v4654_v39  ;;  %4010 = vmatprep.subr.bf16.mxu0 %v4655_v40 }
 0x274   :  { %4032 = vmatprep.subr.bf16.mxu1 %v4656_v41 }
 0x276   :  { %4011 = vmatpush3.bf16.msra.mxu0 %v4657_v42 }
 0x277   :  { %4033 = vmatpush3.bf16.msra.mxu1 %v4658_v43  ;;  %4012 = vmatprep.subr.bf16.mxu0 %v4659_v45  ;;  %v4674_v45 = vld [vmem:[#allocation11 + $0x138] sm:$0xff]  }
 0x278   :  { %4034 = vmatprep.subr.bf16.mxu1 %v4660_v46 }
 0x27a   :  { %4013 = vmatpush3.bf16.msra.mxu0 %v4661_v47 }
 0x27b   :  { %4035 = vmatpush3.bf16.msra.mxu1 %v4662_v48  ;;  %4014 = vmatprep.subr.bf16.mxu0 %v4663_v49 }
 0x27c   :  { %4036 = vmatprep.subr.bf16.mxu1 %v4664_v51 }
 0x27e   :  { %4015 = vmatpush3.bf16.msra.mxu0 %v4665_v52 }
 0x27f   :  { %4037 = vmatpush3.bf16.msra.mxu1 %v4666_v54  ;;  %4093 = vmatprep.subr.bf16.mxu0 %v4879_v44 }
 0x2f4   :  { %v2687_v61 = vpop.f32.mrb[8].mxu0  ;;  %v2859_v62 = vpop.f32.mrb[8].mxu1 }
 0x2f5   :  { %v4113_v63 = vadd.f32 %v2687_v61, %v1046_v56  ;;  %v4117_v0 = vadd.f32 %v2859_v62, %v1054_v2  ;;  %v2689_v21 = vpop.f32.mrb[9].mxu0  ;;  %v2861_v5 = vpop.f32.mrb[9].mxu1 }
 0x2f6   :  { %v4114_v50 = vadd.f32 %v2689_v21, %v1050_v57  ;;  %v4118_v37 = vadd.f32 %v2861_v5, %v1058_v58  ;;  %v2691_v6 = vpop.f32.mrb[10].mxu0  ;;  %v2863_v7 = vpop.f32.mrb[10].mxu1 }
 0x2f7   :  { %v4115_v3 = vadd.f32 %v2691_v6, %v1046_v56  ;;  %v4119_v8 = vadd.f32 %v2863_v7, %v1054_v2  ;;  %v2693_v9 = vpop.f32.mrb[11].mxu0  ;;  %v2865_v17 = vpop.f32.mrb[11].mxu1  ;;  %v3032_v4 = vmax.f32 %v4113_v63, 0.0  ;;  %v3034_v12 = vmax.f32 %v4117_v0, 0.0  ;;  %v3866_v6 = vld [vmem:[#allocation13] ss:$0 sm:$0xff] }
 0x2f8   :  { %v4116_v10 = vadd.f32 %v2693_v9, %v1050_v57  ;;  %v4120_v11 = vadd.f32 %v2865_v17, %v1058_v58  ;;  %v3033_v14 = vmax.f32 %v4114_v50, 0.0  ;;  %v3035_v15 = vmax.f32 %v4118_v37, 0.0 }
 0x2f9   :  { %v3037_v13 = vmax.f32 %v4115_v3, 0.0  ;;  %v3039_v20 = vmax.f32 %v4119_v8, 0.0 }
 0x2fa   :  { %v3038_v16 = vmax.f32 %v4116_v10, 0.0  ;;  %v3040_v18 = vmax.f32 %v4120_v11, 0.0 }
 0x2fb   :  { %v3042_v19 = vpack.c.bf16 %v3037_v13, %v3032_v4  ;;  %v3044_v23 = vpack.c.bf16 %v3039_v20, %v3034_v12 }
 0x2fc   :  { %v3043_v24 = vpack.c.bf16 %v3038_v16, %v3033_v14  ;;  %v3045_v25 = vpack.c.bf16 %v3040_v18, %v3035_v15 }
 0x2fe   :  { %3406 = vmatprep.mubr.bf16.mxu0 %v3043_v24  ;;  %3447 = vmatprep.mubr.bf16.mxu1 %v3045_v25 }
 0x2ff   :  { %3407 = vmatmul.mubr.bf16.vlgmr.msra.gmra.mrb[20].mxu0 %v3042_v19  ;;  %3448 = vmatmul.mubr.bf16.vlgmr.msra.gmra.mrb[20].mxu1 %v3044_v23 }
 0x300   :  { %4094 = vmatpush3.bf16.msra.mxu0 %v4667_v26  ;;  %4109 = vmatprep.mubr.msk.bf16.mxu0 %vm4880_vm0, %v4879_v44 }
 0x301   :  { %4095 = vmatprep.subr.bf16.mxu0 %v4879_v44 }
 0x304   :  { %4096 = vmatpush3.bf16.msra.mxu0 %v4668_v27 }
 0x305   :  { %4097 = vmatprep.subr.bf16.mxu0 %v4879_v44 }
 0x308   :  { %4098 = vmatpush3.bf16.msra.mxu0 %v4669_v28 }
 0x309   :  { %4099 = vmatprep.subr.bf16.mxu0 %v4879_v44 }
 0x30c   :  { %4100 = vmatpush3.bf16.msra.mxu0 %v4670_v29 }
 0x30d   :  { %4101 = vmatprep.subr.bf16.mxu0 %v4879_v44 }
 0x310   :  { %4102 = vmatpush3.bf16.msra.mxu0 %v4671_v30 }
 0x311   :  { %4103 = vmatprep.subr.bf16.mxu0 %v4879_v44 }
 0x314   :  { %v3941_v32 = vpop.f32.mrb[12].mxu0  ;;  %4104 = vmatpush3.bf16.msra.mxu0 %v4672_v31 }
 0x315   :  { %v3963_v36 = vpop.f32.mrb[12].mxu1  ;;  %v3942_v34 = vpop.f32.mrb[13].mxu0  ;;  %4105 = vmatprep.subr.bf16.mxu0 %v4879_v44 }
 0x316   :  { %v3943_v59 = vadd.f32 %v3942_v34, %v3941_v32  ;;  %v3964_v22 = vpop.f32.mrb[13].mxu1  ;;  %v3944_v38 = vpop.f32.mrb[14].mxu0 }
 0x317   :  { %v3965_v53 = vadd.f32 %v3964_v22, %v3963_v36  ;;  %v3966_v39 = vpop.f32.mrb[14].mxu1  ;;  %v3945_v40 = vpop.f32.mrb[15].mxu0 }
 0x318   :  { %v2903_v41 = vadd.f32 %v3943_v59, %v1062_v33  ;;  %v3946_v42 = vadd.f32 %v3945_v40, %v3944_v38  ;;  %v3967_v43 = vpop.f32.mrb[15].mxu1  ;;  %4106 = vmatpush3.bf16.msra.mxu0 %v4673_v35 }
 0x319   :  { %v3968_v46 = vadd.f32 %v3967_v43, %v3966_v39  ;;  %4107 = vmatprep.subr.bf16.mxu0 %v4879_v44 }
 0x31a   :  { %v2944_v1 = vadd.f32 %v3965_v53, %v2903_v41  ;;  %v2906_v60 = vadd.f32 %v3946_v42, %v1062_v33 }
 0x31c   :  { %v2947_v47 = vadd.f32 %v3968_v46, %v2906_v60  ;;  %4108 = vmatpush3.bf16.msra.mxu0 %v4674_v45 }
 0x334   :  { %v3985_v48 = vpop.f32.mrb[16].mxu0 }
 0x335   :  { %v3025_v49 = vpop.f32.mrb[16].mxu1  ;;  %v3986_v51 = vpop.f32.mrb[17].mxu0 }
 0x336   :  { %v3987_v52 = vadd.f32 %v3986_v51, %v3985_v48  ;;  %v4091_v54 = vpop.f32.mrb[17].mxu1  ;;  %v3988_v55 = vpop.f32.mrb[18].mxu0 }
 0x337   :  { %v3028_v56 = vpop.f32.mrb[18].mxu1  ;;  %v3989_v2 = vpop.f32.mrb[19].mxu0 }
 0x338   :  { %v2985_v57 = vadd.f32 %v3987_v52, %v2944_v1  ;;  %v3990_v58 = vadd.f32 %v3989_v2, %v3988_v55  ;;  %v4092_v61 = vpop.f32.mrb[19].mxu1 }
 0x33a   :  { %v3026_v62 = vadd.f32 %v3025_v49, %v2985_v57  ;;  %v2988_v63 = vadd.f32 %v3990_v58, %v2947_v47 }
 0x33c   :  { %v3029_v0 = vadd.f32 %v3028_v56, %v2988_v63  ;;  %v3036_v21 = vmax.f32 %v3026_v62, 0.0 }
 0x33e   :  { %v3041_v44 = vmax.f32 %v3029_v0, 0.0 }
 0x340   :  { %v3046_v5 = vpack.c.bf16 %v3041_v44, %v3036_v21 }
 0x342   :  { %4110 = vmatmul.mubr.bf16.vlgmr.msra.gmra.mrb[24].mxu0 %v3046_v5 }
 0x3d2   :  { %v4016_v50 = vpop.f32.mrb[20].mxu0  ;;  %v4038_v37 = vpop.f32.mrb[20].mxu1 }
 0x3d3   :  { %v4017_v7 = vpop.f32.mrb[21].mxu0  ;;  %v4039_v3 = vpop.f32.mrb[21].mxu1 }
 0x3d4   :  { %v4018_v8 = vadd.f32 %v4017_v7, %v4016_v50  ;;  %v4040_v9 = vadd.f32 %v4039_v3, %v4038_v37  ;;  %v4019_v17 = vpop.f32.mrb[22].mxu0  ;;  %v4041_v10 = vpop.f32.mrb[22].mxu1 }
 0x3d5   :  { %v4020_v11 = vpop.f32.mrb[23].mxu0  ;;  %v4042_v4 = vpop.f32.mrb[23].mxu1 }
 0x3d6   :  { %v3409_v12 = vadd.f32 %v4018_v8, %v3866_v6  ;;  %v4021_v13 = vadd.f32 %v4020_v11, %v4019_v17  ;;  %v4043_v20 = vadd.f32 %v4042_v4, %v4041_v10 }
 0x3d8   :  { %v3412_v14 = vadd.f32 %v4021_v13, %v3866_v6  ;;  %v3450_v15 = vadd.f32 %v4040_v9, %v3409_v12 }
 0x3da   :  { %v3453_v16 = vadd.f32 %v4043_v20, %v3412_v14 }
 0x415   :  { %v3490_v18 = vpop.f32.mrb[24].mxu0 }
 0x416   :  { %v3491_v19 = vadd.f32 %v3490_v18, %v3450_v15  ;;  %v4111_v23 = vpop.f32.mrb[25].mxu0 }
 0x417   :  { %v3493_v24 = vpop.f32.mrb[26].mxu0 }
 0x418   :  { %v3494_v25 = vadd.f32 %v3493_v24, %v3453_v16  ;;  %v4112_v26 = vpop.f32.mrb[27].mxu0  ;;  %4675 = vtanh.f32 %v3491_v19 }
 0x41a   :  { %4677 = vtanh.f32 %v3494_v25 }
 0x422   :  { %v4676_v27 = vpop.eup %4675 }
 0x424   :  { %v4678_v28 = vpop.eup %4677 }
 0x425   :  { %v3914_v29 = vpack.c.bf16 %v4678_v28, %v4676_v27 }
 0x427   :  { %3915 = vst [vmem:[#allocation14] sm:$0xff] %v3914_v29  }
 0x428   :  { %4844 = shalt.err (!%p4841_p4)
}
 0x429   :  { %s4845_s21 = scalar_lea.hbm %s5155_s7, 128 }
 0x42a   :  { %p4846_p5 = scmp.ne.s32.totalorder %s5155_s7, %s4845_s21  ;;  %p4849_p6 = scmp.lt.u32.totalorder %s4845_s21, %s5155_s7 }
 0x42c   :  { %p4851_p7 = pnand %p4849_p6, %p4846_p5 }
 0x42e   :  { %4854 = shalt.err (!%p4851_p7)
}
 0x42f   :  { %3520 = dma.vmem_to_hbm [thread:$0]  %s3515_s8, 128, %s5155_s7, [#allocation4], %s4873_s16, %s4873_s16, %s4874_s17  }
 0x430   :  { %4863 = dma.done.wait [#allocation4], 128  }
 0x431   :  { %4864 = vsyncadd [#allocation4], 4294967168 }
 0x432   :  { %3524 = vsyncpa [#allocation3], 1 }
 0x433   :  { %3525 = vsyncpa [#allocation6], 1 }
 0x434   :  { %3526 = vsyncpa [#allocation9], 1 }
 0x435   :  { %3527 = vsyncpa [#allocation12], 1 }
 0x436   :  { %3528 = vsyncpa [#allocation4], 1 }

</bundles_post_ra>
